<compile_context>
chip_gen: v6e
topology: v6e:2x2x1
jax: 0.10.0
libtpu: 0.0.40
codegen_flags: <defaults>
</compile_context>

<pallas_src>
import numpy as np
import jax
import jax.numpy as jnp
from jax import lax
from jax.experimental import pallas as pl
from jax.experimental.pallas import tpu as pltpu


# ----------------------------------------------------------------------------
# Pallas kernel: one (batch tile, time chunk) step of the BiLSTM + pyramidal
# pairwise max-pool.  Forward consumes chunk k, backward consumes chunk K-1-k.
# ----------------------------------------------------------------------------
def pblstm_kernel(xf_ref, xb_ref, hb0_ref, cb0_ref,
                  wxf_ref, wxb_ref, whf_ref, whb_ref, bf_ref, bb_ref,
                  outf_ref, outb_ref,
                  gxf_ref, gxb_ref, hf_ref, cf_ref, hb_ref, cb_ref):
    # xf_ref/xb_ref : (Tc, BN, D) bf16   forward / backward time chunks
    # hb0/cb0       : (BN, H)    f32     backward initial state (odd-T seed)
    # wxf/wxb       : (D, 4H)    bf16    input -> gates (pre-transposed)
    # whf/whb       : (H, 4H)    bf16    hidden -> gates (pre-transposed)
    # bf/bb         : (1, 4H)    f32     combined biases
    # outf/outb     : (Pc, BN, H) f32    max-pooled outputs for this chunk
    # gxf/gxb       : (Tc*BN, 4H) bf16   scratch: chunk input pre-activations
    # hf/cf/hb/cb   : (BN, H)    f32     scratch: recurrent carries
    Tc, BN, D = xf_ref.shape
    Pc = outf_ref.shape[0]
    H = outf_ref.shape[2]
    G = 4 * H

    # ---- reset / seed the recurrent carries at the start of each batch tile
    @pl.when(pl.program_id(1) == 0)
    def _():
        z = jnp.zeros((BN, H), jnp.float32)
        hf_ref[...] = z
        cf_ref[...] = z
        hb_ref[...] = hb0_ref[...]
        cb_ref[...] = cb0_ref[...]

    # ---- (1) chunked input projection (both directions), biases folded.
    # One large bf16 MXU matmul per direction per chunk; stored bf16.
    xf = xf_ref[...].reshape(Tc * BN, D)
    xb = xb_ref[...].reshape(Tc * BN, D)
    gxf_ref[...] = (jnp.dot(xf, wxf_ref[...], preferred_element_type=jnp.float32)
                    + bf_ref[...]).astype(gxf_ref.dtype)
    gxb_ref[...] = (jnp.dot(xb, wxb_ref[...], preferred_element_type=jnp.float32)
                    + bb_ref[...]).astype(gxb_ref.dtype)

    whf = whf_ref[...]
    whb = whb_ref[...]

    def gate_step(pre, h, c, whh):
        # pre already contains x_t @ Wih^T + b; only the recurrent matmul left.
        gates = pre.astype(jnp.float32) + jnp.dot(
            h.astype(whh.dtype), whh, preferred_element_type=jnp.float32)
        i_g = jax.nn.sigmoid(gates[:, 0:H])
        f_g = jax.nn.sigmoid(gates[:, H:2 * H])
        g_g = jnp.tanh(gates[:, 2 * H:3 * H])
        o_g = jax.nn.sigmoid(gates[:, 3 * H:4 * H])
        c_new = f_g * c + i_g * g_g
        h_new = o_g * jnp.tanh(c_new)
        return h_new, c_new

    # ---- (2) fused fwd+bwd recurrence over the chunk, pairwise max fused in.
    def body(p, carry):
        hf, cf, hb, cb = carry
        q = Pc - 1 - p

        rf = pl.multiple_of(2 * p * BN, 2 * BN)
        rb = pl.multiple_of(2 * q * BN, 2 * BN)

        # forward: chunk-local t = 2p then 2p+1
        hf1, cf1 = gate_step(gxf_ref[pl.ds(rf, BN)], hf, cf, whf)
        hf2, cf2 = gate_step(gxf_ref[pl.ds(pl.multiple_of(rf + BN, BN), BN)],
                             hf1, cf1, whf)
        # backward: chunk-local t = 2q+1 then 2q
        hb1, cb1 = gate_step(gxb_ref[pl.ds(pl.multiple_of(rb + BN, BN), BN)],
                             hb, cb, whb)
        hb2, cb2 = gate_step(gxb_ref[pl.ds(rb, BN)], hb1, cb1, whb)

        outf_ref[p] = jnp.maximum(hf1, hf2)
        outb_ref[q] = jnp.maximum(hb1, hb2)
        return (hf2, cf2, hb2, cb2)

    # Unroll only when the per-step gate tile is small (vreg pressure at large BN).
    unroll = 2 if (BN * G) <= 16384 else 1
    carry0 = (hf_ref[...], cf_ref[...], hb_ref[...], cb_ref[...])
    hf, cf, hb, cb = lax.fori_loop(0, Pc, body, carry0, unroll=unroll)
    hf_ref[...] = hf
    cf_ref[...] = cf
    hb_ref[...] = hb
    cb_ref[...] = cb


# ----------------------------------------------------------------------------
# Wrapper (layout, padding, param prep, length bookkeeping)
# ----------------------------------------------------------------------------
def _largest_even_divisor(t, cap):
    cap = max(2, min(cap, t))
    cap -= cap % 2
    for c in range(cap, 1, -2):
        if t % c == 0:
            return c
    return 2


def pblstm_forward(x, params, lens=None, block_n=128, time_chunk=128):
    """x: (N, T, D) batch-first. Returns (out, new_lens), out: (N, T//2, 2H)."""
    N, T_orig, D = x.shape
    H = params["whh_f"].shape[1]
    G = 4 * H

    if lens is None:
        lens = jnp.full((N,), T_orig, dtype=jnp.int32)

    # The PyTorch module runs the BiLSTM over all T frames and drops the last
    # OUTPUT frame when T is odd.  We drop the last INPUT frame, but first take
    # one exact f32 backward LSTM step on it so the backward state entering the
    # kernel matches the module.
    if T_orig % 2 != 0:
        x_last = x[:, T_orig - 1, :].astype(jnp.float32)
        g = x_last @ params["wih_b"].T + (params["bih_b"] + params["bhh_b"])
        i_g, _f_g, g_g, o_g = jnp.split(g, 4, axis=-1)
        cb0 = jax.nn.sigmoid(i_g) * jnp.tanh(g_g)          # c_prev == 0
        hb0 = jax.nn.sigmoid(o_g) * jnp.tanh(cb0)
        x = x[:, :T_orig - 1, :]
        T = T_orig - 1
    else:
        hb0 = jnp.zeros((N, H), jnp.float32)
        cb0 = jnp.zeros((N, H), jnp.float32)
        T = T_orig
    P = T // 2

    # Batch tile: multiple of 8, clamped so tiny batches don't over-pad.
    block_n = max(8, min(int(block_n), ((N + 7) // 8) * 8))
    block_n = ((block_n + 7) // 8) * 8
    Npad = ((N + block_n - 1) // block_n) * block_n
    nb = Npad // block_n
    # TODO(synk): on v7x choose block_n so nb >= 2 (megacore batch sharding).

    # Time chunk: even divisor of T -> VMEM bounded independent of T.
    Tc = _largest_even_divisor(T, int(time_chunk))
    K = T // Tc
    Pc = Tc // 2

    cdt = jnp.bfloat16

    x_tm = jnp.swapaxes(x, 0, 1).astype(cdt)                         # (T, N, D)
    n_pad = Npad - N
    if n_pad:
        x_tm = jnp.pad(x_tm, ((0, 0), (0, n_pad), (0, 0)))
        hb0 = jnp.pad(hb0, ((0, n_pad), (0, 0)))
        cb0 = jnp.pad(cb0, ((0, n_pad), (0, 0)))

    wxf = params["wih_f"].T.astype(cdt)                              # (D, 4H)
    wxb = params["wih_b"].T.astype(cdt)
    whf = params["whh_f"].T.astype(cdt)                              # (H, 4H)
    whb = params["whh_b"].T.astype(cdt)
    bf = (params["bih_f"] + params["bhh_f"]).reshape(1, G).astype(jnp.float32)
    bb = (params["bih_b"] + params["bhh_b"]).reshape(1, G).astype(jnp.float32)

    # Loop-invariant weights: whole array resident in VMEM, single-buffered.
    wspec = pl.BlockSpec(memory_space=pltpu.MemorySpace.VMEM)

    grid_spec = pltpu.PrefetchScalarGridSpec(
        num_scalar_prefetch=0,
        grid=(nb, K),
        in_specs=[
            pl.BlockSpec((Tc, block_n, D), lambda bi, k: (k, bi, 0)),          # fwd x
            pl.BlockSpec((Tc, block_n, D), lambda bi, k: (K - 1 - k, bi, 0)),  # bwd x
            pl.BlockSpec((block_n, H), lambda bi, k: (bi, 0)),                 # hb0
            pl.BlockSpec((block_n, H), lambda bi, k: (bi, 0)),                 # cb0
            wspec, wspec, wspec, wspec, wspec, wspec,
        ],
        out_specs=[
            pl.BlockSpec((Pc, block_n, H), lambda bi, k: (k, bi, 0)),          # fwd out
            pl.BlockSpec((Pc, block_n, H), lambda bi, k: (K - 1 - k, bi, 0)),  # bwd out
        ],
        scratch_shapes=[
            pltpu.VMEM((Tc * block_n, G), cdt),         # gxf
            pltpu.VMEM((Tc * block_n, G), cdt),         # gxb
            pltpu.VMEM((block_n, H), jnp.float32),      # hf
            pltpu.VMEM((block_n, H), jnp.float32),      # cf
            pltpu.VMEM((block_n, H), jnp.float32),      # hb
            pltpu.VMEM((block_n, H), jnp.float32),      # cb
        ],
    )

    # Explicit scoped-VMEM budget (double-buffered x/out tiles + scratch + weights).
    x_tile = Tc * block_n * D * 2
    out_tile = Pc * block_n * H * 4
    gx_bytes = 2 * Tc * block_n * G * 2
    w_bytes = (2 * D * G + 2 * H * G) * 2 + 2 * G * 4
    carry_bytes = 4 * block_n * H * 4 + 2 * 2 * block_n * H * 4
    need = 2 * 2 * x_tile + 2 * 2 * out_tile + gx_bytes + w_bytes + carry_bytes
    vmem_limit = int(min(max(2 * need, 32 * (1 << 20)), 100 * (1 << 20)))

    flops = 4 * T * Npad * D * G + 4 * T * Npad * H * G
    transc = 2 * T * Npad * 5 * H
    bytes_acc = (2 * 2 * T * Npad * D + w_bytes + 4 * 2 * P * Npad * H)

    out_f, out_b = pl.pallas_call(
        pblstm_kernel,
        out_shape=(jax.ShapeDtypeStruct((P, Npad, H), jnp.float32),
                   jax.ShapeDtypeStruct((P, Npad, H), jnp.float32)),
        grid_spec=grid_spec,
        compiler_params=pltpu.CompilerParams(
            dimension_semantics=("parallel", "arbitrary"),
            vmem_limit_bytes=vmem_limit),
        cost_estimate=pl.CostEstimate(
            flops=flops, transcendentals=transc, bytes_accessed=bytes_acc),
    )(x_tm, x_tm, hb0, cb0, wxf, wxb, whf, whb, bf, bb)

    out = jnp.concatenate([out_f[:, :N, :], out_b[:, :N, :]], axis=-1)  # (P,N,2H)
    out = jnp.swapaxes(out, 0, 1)                                       # (N,P,2H)

    # TODO(synk): ragged (packed) sequences only reflected in returned lens.
    new_lens = (lens - (lens % 2)) // 2
    return out, new_lens


# ----------------------------------------------------------------------------
# Pure-JAX reference (mirrors torch.nn.LSTM + the module's drop/reshape/max)
# ----------------------------------------------------------------------------
def _lstm_dir_ref(x, wih, whh, bih, bhh, reverse=False):
    N, T, D = x.shape
    H = whh.shape[1]
    b = bih + bhh

    def step(carry, x_t):
        h, c = carry
        gates = x_t @ wih.T + h @ whh.T + b
        i, f, g, o = jnp.split(gates, 4, axis=-1)
        i, f, o = jax.nn.sigmoid(i), jax.nn.sigmoid(f), jax.nn.sigmoid(o)
        g = jnp.tanh(g)
        c = f * c + i * g
        h = o * jnp.tanh(c)
        return (h, c), h

    xs = jnp.swapaxes(x, 0, 1)
    if reverse:
        xs = xs[::-1]
    _, hs = lax.scan(step, (jnp.zeros((N, H)), jnp.zeros((N, H))), xs)
    if reverse:
        hs = hs[::-1]
    return jnp.swapaxes(hs, 0, 1)  # (N, T, H)


def pblstm_reference(x, params):
    hf = _lstm_dir_ref(x, params["wih_f"], params["whh_f"],
                       params["bih_f"], params["bhh_f"], reverse=False)
    hb = _lstm_dir_ref(x, params["wih_b"], params["whh_b"],
                       params["bih_b"], params["bhh_b"], reverse=True)
    out = jnp.concatenate([hf, hb], axis=-1)                 # (N, T, 2H)
    N, T, H2 = out.shape
    if T % 2 != 0:
        out = out[:, :T - 1, :]
        T -= 1
    out = out.reshape(N, T // 2, 2, H2)
    return jnp.max(out, axis=2)                              # (N, T//2, 2H)


# ----------------------------------------------------------------------------
# Main
# ----------------------------------------------------------------------------
if __name__ == "__main__":
    N, T, D, H = 10, 13, 8, 32     # odd T exercises the module's drop-last-frame path

    key = jax.random.PRNGKey(0)
    ks = jax.random.split(key, 9)
    bound = 1.0 / np.sqrt(H)

    def u(k, shape):
        return jax.random.uniform(k, shape, jnp.float32, -bound, bound)

    # nn.LSTM(input_dim=D, hidden_dim=H, bidirectional=True) parameter shapes
    params = {
        "wih_f": u(ks[0], (4 * H, D)), "whh_f": u(ks[1], (4 * H, H)),
        "bih_f": u(ks[2], (4 * H,)),   "bhh_f": u(ks[3], (4 * H,)),
        "wih_b": u(ks[4], (4 * H, D)), "whh_b": u(ks[5], (4 * H, H)),
        "bih_b": u(ks[6], (4 * H,)),   "bhh_b": u(ks[7], (4 * H,)),
    }

    x = jax.random.normal(ks[8], (N, T, D), jnp.float32)

    # Small block_n / time_chunk here just to exercise the batch grid (nb=2)
    # and the time-chunked recurrence (K=3) at toy shapes; production defaults
    # are block_n=128, time_chunk=128.
    out, new_lens = pblstm_forward(x, params, block_n=8, time_chunk=4)
    out = jax.block_until_ready(out)

    ref = jax.block_until_ready(pblstm_reference(x, params))

    P = (T - (T % 2)) // 2
    assert out.shape == (N, P, 2 * H), out.shape
    # bf16 bulk data + f32 accumulation -> loosened tolerance vs f32 reference
    assert np.allclose(np.asarray(out), np.asarray(ref), atol=3e-2, rtol=3e-2), (
        np.max(np.abs(np.asarray(out) - np.asarray(ref))))
    assert np.array_equal(np.asarray(new_lens), np.full((N,), P))

    print("KERNEL_OK")
</pallas_src>

<mosaic_0001>
module attributes {stable_mosaic.version = 11 : i64} {
  func.func @pblstm_kernel(%arg0: i32, %arg1: i32, %arg2: memref<4x8x8xbf16, #tpu.memory_space<vmem>>, %arg3: memref<4x8x8xbf16, #tpu.memory_space<vmem>>, %arg4: memref<8x32xf32, #tpu.memory_space<vmem>>, %arg5: memref<8x32xf32, #tpu.memory_space<vmem>>, %arg6: memref<8x128xbf16, #tpu.memory_space<vmem>>, %arg7: memref<8x128xbf16, #tpu.memory_space<vmem>>, %arg8: memref<32x128xbf16, #tpu.memory_space<vmem>>, %arg9: memref<32x128xbf16, #tpu.memory_space<vmem>>, %arg10: memref<1x128xf32, #tpu.memory_space<vmem>>, %arg11: memref<1x128xf32, #tpu.memory_space<vmem>>, %arg12: memref<2x8x32xf32, #tpu.memory_space<vmem>>, %arg13: memref<2x8x32xf32, #tpu.memory_space<vmem>>, %arg14: memref<32x128xbf16, #tpu.memory_space<vmem>>, %arg15: memref<32x128xbf16, #tpu.memory_space<vmem>>, %arg16: memref<8x32xf32, #tpu.memory_space<vmem>>, %arg17: memref<8x32xf32, #tpu.memory_space<vmem>>, %arg18: memref<8x32xf32, #tpu.memory_space<vmem>>, %arg19: memref<8x32xf32, #tpu.memory_space<vmem>>) attributes {dimension_semantics = [#tpu.dimension_semantics<parallel>, #tpu.dimension_semantics<arbitrary>], iteration_bounds = array<i64: 2, 3>, scalar_prefetch = 0 : i64, scratch_operands = 6 : i64, tpu.core_type = #tpu.core_type<tc>, window_params = [{transform_indices = @transform_0, window_bounds = array<i64: 4, 8, 8>}, {transform_indices = @transform_1, window_bounds = array<i64: 4, 8, 8>}, {transform_indices = @transform_2, window_bounds = array<i64: 8, 32>}, {transform_indices = @transform_3, window_bounds = array<i64: 8, 32>}, {pipeline_mode = #tpu.pipeline_mode<synchronous>, transform_indices = @transform_4, window_bounds = array<i64: 8, 128>}, {pipeline_mode = #tpu.pipeline_mode<synchronous>, transform_indices = @transform_5, window_bounds = array<i64: 8, 128>}, {pipeline_mode = #tpu.pipeline_mode<synchronous>, transform_indices = @transform_6, window_bounds = array<i64: 32, 128>}, {pipeline_mode = #tpu.pipeline_mode<synchronous>, transform_indices = @transform_7, window_bounds = array<i64: 32, 128>}, {pipeline_mode = #tpu.pipeline_mode<synchronous>, transform_indices = @transform_8, window_bounds = array<i64: 1, 128>}, {pipeline_mode = #tpu.pipeline_mode<synchronous>, transform_indices = @transform_9, window_bounds = array<i64: 1, 128>}, {transform_indices = @transform_10, window_bounds = array<i64: 2, 8, 32>}, {transform_indices = @transform_11, window_bounds = array<i64: 2, 8, 32>}]} {
    %c0_i32 = arith.constant 0 : i32
    %0 = arith.cmpi eq, %arg1, %c0_i32 : i32
    %1 = arith.extui %0 : i1 to i32
    %c0_i32_0 = arith.constant 0 : i32
    %2 = arith.cmpi ne, %1, %c0_i32_0 : i32
    scf.if %2 {
      %cst_101 = arith.constant 0.000000e+00 : f32
      %321 = vector.broadcast %cst_101 : f32 to vector<8x32xf32>
      %c0_102 = arith.constant 0 : index
      %c0_103 = arith.constant 0 : index
      %322 = vector.load %arg16[%c0_102, %c0_103] : memref<8x32xf32, #tpu.memory_space<vmem>>, vector<8x32xf32>
      tpu.vector_store %arg16[%c0_102, %c0_103], %321 {strides = array<i32>} : memref<8x32xf32, #tpu.memory_space<vmem>>, vector<8x32xf32>,
      %c0_104 = arith.constant 0 : index
      %c0_105 = arith.constant 0 : index
      %323 = vector.load %arg17[%c0_104, %c0_105] : memref<8x32xf32, #tpu.memory_space<vmem>>, vector<8x32xf32>
      tpu.vector_store %arg17[%c0_104, %c0_105], %321 {strides = array<i32>} : memref<8x32xf32, #tpu.memory_space<vmem>>, vector<8x32xf32>,
      %c0_106 = arith.constant 0 : index
      %c0_107 = arith.constant 0 : index
      %324 = vector.load %arg4[%c0_106, %c0_107] : memref<8x32xf32, #tpu.memory_space<vmem>>, vector<8x32xf32>
      %c0_108 = arith.constant 0 : index
      %c0_109 = arith.constant 0 : index
      %325 = vector.load %arg18[%c0_108, %c0_109] : memref<8x32xf32, #tpu.memory_space<vmem>>, vector<8x32xf32>
      tpu.vector_store %arg18[%c0_108, %c0_109], %324 {strides = array<i32>} : memref<8x32xf32, #tpu.memory_space<vmem>>, vector<8x32xf32>,
      %c0_110 = arith.constant 0 : index
      %c0_111 = arith.constant 0 : index
      %326 = vector.load %arg5[%c0_110, %c0_111] : memref<8x32xf32, #tpu.memory_space<vmem>>, vector<8x32xf32>
      %c0_112 = arith.constant 0 : index
      %c0_113 = arith.constant 0 : index
      %327 = vector.load %arg19[%c0_112, %c0_113] : memref<8x32xf32, #tpu.memory_space<vmem>>, vector<8x32xf32>
      tpu.vector_store %arg19[%c0_112, %c0_113], %326 {strides = array<i32>} : memref<8x32xf32, #tpu.memory_space<vmem>>, vector<8x32xf32>,
    } else {
    }
    %c0 = arith.constant 0 : index
    %c0_1 = arith.constant 0 : index
    %c0_2 = arith.constant 0 : index
    %3 = vector.load %arg2[%c0, %c0_1, %c0_2] : memref<4x8x8xbf16, #tpu.memory_space<vmem>>, vector<4x8x8xbf16>
    %4 = vector.shape_cast %3 : vector<4x8x8xbf16> to vector<32x8xbf16>
    %c0_3 = arith.constant 0 : index
    %c0_4 = arith.constant 0 : index
    %c0_5 = arith.constant 0 : index
    %5 = vector.load %arg3[%c0_3, %c0_4, %c0_5] : memref<4x8x8xbf16, #tpu.memory_space<vmem>>, vector<4x8x8xbf16>
    %6 = vector.shape_cast %5 : vector<4x8x8xbf16> to vector<32x8xbf16>
    %c0_6 = arith.constant 0 : index
    %c0_7 = arith.constant 0 : index
    %7 = vector.load %arg6[%c0_6, %c0_7] : memref<8x128xbf16, #tpu.memory_space<vmem>>, vector<8x128xbf16>
    %cst = arith.constant dense<0.000000e+00> : vector<32x128xf32>
    %8 = tpu.matmul %4, %7, %cst {dimension_numbers = #tpu.dot_dimension_numbers<[1], [0], [0], [1], [0, 0, 1, 1], [], []>} : vector<32x8xbf16>, vector<8x128xbf16>, vector<32x128xf32> -> vector<32x128xf32>
    %c0_8 = arith.constant 0 : index
    %c0_9 = arith.constant 0 : index
    %9 = vector.load %arg10[%c0_8, %c0_9] : memref<1x128xf32, #tpu.memory_space<vmem>>, vector<1x128xf32>
    %10 = vector.broadcast %9 : vector<1x128xf32> to vector<32x128xf32>
    %11 = arith.addf %8, %10 : vector<32x128xf32>
    %12 = arith.truncf %11 : vector<32x128xf32> to vector<32x128xbf16>
    %c0_10 = arith.constant 0 : index
    %c0_11 = arith.constant 0 : index
    %13 = vector.load %arg14[%c0_10, %c0_11] : memref<32x128xbf16, #tpu.memory_space<vmem>>, vector<32x128xbf16>
    tpu.vector_store %arg14[%c0_10, %c0_11], %12 {strides = array<i32>} : memref<32x128xbf16, #tpu.memory_space<vmem>>, vector<32x128xbf16>,
    %c0_12 = arith.constant 0 : index
    %c0_13 = arith.constant 0 : index
    %14 = vector.load %arg7[%c0_12, %c0_13] : memref<8x128xbf16, #tpu.memory_space<vmem>>, vector<8x128xbf16>
    %cst_14 = arith.constant dense<0.000000e+00> : vector<32x128xf32>
    %15 = tpu.matmul %6, %14, %cst_14 {dimension_numbers = #tpu.dot_dimension_numbers<[1], [0], [0], [1], [0, 0, 1, 1], [], []>} : vector<32x8xbf16>, vector<8x128xbf16>, vector<32x128xf32> -> vector<32x128xf32>
    %c0_15 = arith.constant 0 : index
    %c0_16 = arith.constant 0 : index
    %16 = vector.load %arg11[%c0_15, %c0_16] : memref<1x128xf32, #tpu.memory_space<vmem>>, vector<1x128xf32>
    %17 = vector.broadcast %16 : vector<1x128xf32> to vector<32x128xf32>
    %18 = arith.addf %15, %17 : vector<32x128xf32>
    %19 = arith.truncf %18 : vector<32x128xf32> to vector<32x128xbf16>
    %c0_17 = arith.constant 0 : index
    %c0_18 = arith.constant 0 : index
    %20 = vector.load %arg15[%c0_17, %c0_18] : memref<32x128xbf16, #tpu.memory_space<vmem>>, vector<32x128xbf16>
    tpu.vector_store %arg15[%c0_17, %c0_18], %19 {strides = array<i32>} : memref<32x128xbf16, #tpu.memory_space<vmem>>, vector<32x128xbf16>,
    %c0_19 = arith.constant 0 : index
    %c0_20 = arith.constant 0 : index
    %21 = vector.load %arg8[%c0_19, %c0_20] : memref<32x128xbf16, #tpu.memory_space<vmem>>, vector<32x128xbf16>
    %c0_21 = arith.constant 0 : index
    %c0_22 = arith.constant 0 : index
    %22 = vector.load %arg9[%c0_21, %c0_22] : memref<32x128xbf16, #tpu.memory_space<vmem>>, vector<32x128xbf16>
    %c0_23 = arith.constant 0 : index
    %c0_24 = arith.constant 0 : index
    %23 = vector.load %arg16[%c0_23, %c0_24] : memref<8x32xf32, #tpu.memory_space<vmem>>, vector<8x32xf32>
    %c0_25 = arith.constant 0 : index
    %c0_26 = arith.constant 0 : index
    %24 = vector.load %arg17[%c0_25, %c0_26] : memref<8x32xf32, #tpu.memory_space<vmem>>, vector<8x32xf32>
    %c0_27 = arith.constant 0 : index
    %c0_28 = arith.constant 0 : index
    %25 = vector.load %arg18[%c0_27, %c0_28] : memref<8x32xf32, #tpu.memory_space<vmem>>, vector<8x32xf32>
    %c0_29 = arith.constant 0 : index
    %c0_30 = arith.constant 0 : index
    %26 = vector.load %arg19[%c0_29, %c0_30] : memref<8x32xf32, #tpu.memory_space<vmem>>, vector<8x32xf32>
    %c0_i32_31 = arith.constant 0 : i32
    %c1_i32 = arith.constant 1 : i32
    %27 = arith.subi %c1_i32, %c0_i32_31 : i32
    %c2_i32 = arith.constant 2 : i32
    %28 = arith.muli %c2_i32, %c0_i32_31 : i32
    %c8_i32 = arith.constant 8 : i32
    %29 = arith.muli %28, %c8_i32 : i32
    %30 = tpu.assume_multiple %29, 16 : i32
    %c2_i32_32 = arith.constant 2 : i32
    %31 = arith.muli %c2_i32_32, %27 : i32
    %c8_i32_33 = arith.constant 8 : i32
    %32 = arith.muli %31, %c8_i32_33 : i32
    %33 = tpu.assume_multiple %32, 16 : i32
    %34 = arith.index_cast %30 : i32 to index
    %c0_34 = arith.constant 0 : index
    %35 = vector.load %arg14[%34, %c0_34] : memref<32x128xbf16, #tpu.memory_space<vmem>>, vector<8x128xbf16>
    %36 = arith.extf %35 : vector<8x128xbf16> to vector<8x128xf32>
    %37 = arith.truncf %23 : vector<8x32xf32> to vector<8x32xbf16>
    %cst_35 = arith.constant dense<0.000000e+00> : vector<8x128xf32>
    %38 = tpu.matmul %37, %21, %cst_35 {dimension_numbers = #tpu.dot_dimension_numbers<[1], [0], [0], [1], [0, 0, 1, 1], [], []>} : vector<8x32xbf16>, vector<32x128xbf16>, vector<8x128xf32> -> vector<8x128xf32>
    %39 = arith.addf %36, %38 : vector<8x128xf32>
    %40 = vector.extract_strided_slice %39 {offsets = [0, 0], sizes = [8, 32], strides = [1, 1]} : vector<8x128xf32> to vector<8x32xf32>
    %41 = arith.negf %40 : vector<8x32xf32>
    %42 = math.exp %41 : vector<8x32xf32>
    %cst_36 = arith.constant 1.000000e+00 : f32
    %43 = vector.broadcast %cst_36 : f32 to vector<8x32xf32>
    %44 = arith.addf %43, %42 : vector<8x32xf32>
    %45 = arith.divf %43, %44 : vector<8x32xf32>
    %46 = vector.extract_strided_slice %39 {offsets = [0, 32], sizes = [8, 32], strides = [1, 1]} : vector<8x128xf32> to vector<8x32xf32>
    %47 = arith.negf %46 : vector<8x32xf32>
    %48 = math.exp %47 : vector<8x32xf32>
    %cst_37 = arith.constant 1.000000e+00 : f32
    %49 = vector.broadcast %cst_37 : f32 to vector<8x32xf32>
    %50 = arith.addf %49, %48 : vector<8x32xf32>
    %51 = arith.divf %49, %50 : vector<8x32xf32>
    %52 = vector.extract_strided_slice %39 {offsets = [0, 64], sizes = [8, 32], strides = [1, 1]} : vector<8x128xf32> to vector<8x32xf32>
    %53 = math.tanh %52 : vector<8x32xf32>
    %54 = vector.extract_strided_slice %39 {offsets = [0, 96], sizes = [8, 32], strides = [1, 1]} : vector<8x128xf32> to vector<8x32xf32>
    %55 = arith.negf %54 : vector<8x32xf32>
    %56 = math.exp %55 : vector<8x32xf32>
    %cst_38 = arith.constant 1.000000e+00 : f32
    %57 = vector.broadcast %cst_38 : f32 to vector<8x32xf32>
    %58 = arith.addf %57, %56 : vector<8x32xf32>
    %59 = arith.divf %57, %58 : vector<8x32xf32>
    %60 = arith.mulf %51, %24 : vector<8x32xf32>
    %61 = arith.mulf %45, %53 : vector<8x32xf32>
    %62 = arith.addf %60, %61 : vector<8x32xf32>
    %63 = math.tanh %62 : vector<8x32xf32>
    %64 = arith.mulf %59, %63 : vector<8x32xf32>
    %c8_i32_39 = arith.constant 8 : i32
    %65 = arith.addi %30, %c8_i32_39 : i32
    %66 = tpu.assume_multiple %65, 8 : i32
    %67 = arith.index_cast %66 : i32 to index
    %c0_40 = arith.constant 0 : index
    %68 = vector.load %arg14[%67, %c0_40] : memref<32x128xbf16, #tpu.memory_space<vmem>>, vector<8x128xbf16>
    %69 = arith.extf %68 : vector<8x128xbf16> to vector<8x128xf32>
    %70 = arith.truncf %64 : vector<8x32xf32> to vector<8x32xbf16>
    %cst_41 = arith.constant dense<0.000000e+00> : vector<8x128xf32>
    %71 = tpu.matmul %70, %21, %cst_41 {dimension_numbers = #tpu.dot_dimension_numbers<[1], [0], [0], [1], [0, 0, 1, 1], [], []>} : vector<8x32xbf16>, vector<32x128xbf16>, vector<8x128xf32> -> vector<8x128xf32>
    %72 = arith.addf %69, %71 : vector<8x128xf32>
    %73 = vector.extract_strided_slice %72 {offsets = [0, 0], sizes = [8, 32], strides = [1, 1]} : vector<8x128xf32> to vector<8x32xf32>
    %74 = arith.negf %73 : vector<8x32xf32>
    %75 = math.exp %74 : vector<8x32xf32>
    %cst_42 = arith.constant 1.000000e+00 : f32
    %76 = vector.broadcast %cst_42 : f32 to vector<8x32xf32>
    %77 = arith.addf %76, %75 : vector<8x32xf32>
    %78 = arith.divf %76, %77 : vector<8x32xf32>
    %79 = vector.extract_strided_slice %72 {offsets = [0, 32], sizes = [8, 32], strides = [1, 1]} : vector<8x128xf32> to vector<8x32xf32>
    %80 = arith.negf %79 : vector<8x32xf32>
    %81 = math.exp %80 : vector<8x32xf32>
    %cst_43 = arith.constant 1.000000e+00 : f32
    %82 = vector.broadcast %cst_43 : f32 to vector<8x32xf32>
    %83 = arith.addf %82, %81 : vector<8x32xf32>
    %84 = arith.divf %82, %83 : vector<8x32xf32>
    %85 = vector.extract_strided_slice %72 {offsets = [0, 64], sizes = [8, 32], strides = [1, 1]} : vector<8x128xf32> to vector<8x32xf32>
    %86 = math.tanh %85 : vector<8x32xf32>
    %87 = vector.extract_strided_slice %72 {offsets = [0, 96], sizes = [8, 32], strides = [1, 1]} : vector<8x128xf32> to vector<8x32xf32>
    %88 = arith.negf %87 : vector<8x32xf32>
    %89 = math.exp %88 : vector<8x32xf32>
    %cst_44 = arith.constant 1.000000e+00 : f32
    %90 = vector.broadcast %cst_44 : f32 to vector<8x32xf32>
    %91 = arith.addf %90, %89 : vector<8x32xf32>
    %92 = arith.divf %90, %91 : vector<8x32xf32>
    %93 = arith.mulf %84, %62 : vector<8x32xf32>
    %94 = arith.mulf %78, %86 : vector<8x32xf32>
    %95 = arith.addf %93, %94 : vector<8x32xf32>
    %96 = math.tanh %95 : vector<8x32xf32>
    %97 = arith.mulf %92, %96 : vector<8x32xf32>
    %c8_i32_45 = arith.constant 8 : i32
    %98 = arith.addi %33, %c8_i32_45 : i32
    %99 = tpu.assume_multiple %98, 8 : i32
    %100 = arith.index_cast %99 : i32 to index
    %c0_46 = arith.constant 0 : index
    %101 = vector.load %arg15[%100, %c0_46] : memref<32x128xbf16, #tpu.memory_space<vmem>>, vector<8x128xbf16>
    %102 = arith.extf %101 : vector<8x128xbf16> to vector<8x128xf32>
    %103 = arith.truncf %25 : vector<8x32xf32> to vector<8x32xbf16>
    %cst_47 = arith.constant dense<0.000000e+00> : vector<8x128xf32>
    %104 = tpu.matmul %103, %22, %cst_47 {dimension_numbers = #tpu.dot_dimension_numbers<[1], [0], [0], [1], [0, 0, 1, 1], [], []>} : vector<8x32xbf16>, vector<32x128xbf16>, vector<8x128xf32> -> vector<8x128xf32>
    %105 = arith.addf %102, %104 : vector<8x128xf32>
    %106 = vector.extract_strided_slice %105 {offsets = [0, 0], sizes = [8, 32], strides = [1, 1]} : vector<8x128xf32> to vector<8x32xf32>
    %107 = arith.negf %106 : vector<8x32xf32>
    %108 = math.exp %107 : vector<8x32xf32>
    %cst_48 = arith.constant 1.000000e+00 : f32
    %109 = vector.broadcast %cst_48 : f32 to vector<8x32xf32>
    %110 = arith.addf %109, %108 : vector<8x32xf32>
    %111 = arith.divf %109, %110 : vector<8x32xf32>
    %112 = vector.extract_strided_slice %105 {offsets = [0, 32], sizes = [8, 32], strides = [1, 1]} : vector<8x128xf32> to vector<8x32xf32>
    %113 = arith.negf %112 : vector<8x32xf32>
    %114 = math.exp %113 : vector<8x32xf32>
    %cst_49 = arith.constant 1.000000e+00 : f32
    %115 = vector.broadcast %cst_49 : f32 to vector<8x32xf32>
    %116 = arith.addf %115, %114 : vector<8x32xf32>
    %117 = arith.divf %115, %116 : vector<8x32xf32>
    %118 = vector.extract_strided_slice %105 {offsets = [0, 64], sizes = [8, 32], strides = [1, 1]} : vector<8x128xf32> to vector<8x32xf32>
    %119 = math.tanh %118 : vector<8x32xf32>
    %120 = vector.extract_strided_slice %105 {offsets = [0, 96], sizes = [8, 32], strides = [1, 1]} : vector<8x128xf32> to vector<8x32xf32>
    %121 = arith.negf %120 : vector<8x32xf32>
    %122 = math.exp %121 : vector<8x32xf32>
    %cst_50 = arith.constant 1.000000e+00 : f32
    %123 = vector.broadcast %cst_50 : f32 to vector<8x32xf32>
    %124 = arith.addf %123, %122 : vector<8x32xf32>
    %125 = arith.divf %123, %124 : vector<8x32xf32>
    %126 = arith.mulf %117, %26 : vector<8x32xf32>
    %127 = arith.mulf %111, %119 : vector<8x32xf32>
    %128 = arith.addf %126, %127 : vector<8x32xf32>
    %129 = math.tanh %128 : vector<8x32xf32>
    %130 = arith.mulf %125, %129 : vector<8x32xf32>
    %131 = arith.index_cast %33 : i32 to index
    %c0_51 = arith.constant 0 : index
    %132 = vector.load %arg15[%131, %c0_51] : memref<32x128xbf16, #tpu.memory_space<vmem>>, vector<8x128xbf16>
    %133 = arith.extf %132 : vector<8x128xbf16> to vector<8x128xf32>
    %134 = arith.truncf %130 : vector<8x32xf32> to vector<8x32xbf16>
    %cst_52 = arith.constant dense<0.000000e+00> : vector<8x128xf32>
    %135 = tpu.matmul %134, %22, %cst_52 {dimension_numbers = #tpu.dot_dimension_numbers<[1], [0], [0], [1], [0, 0, 1, 1], [], []>} : vector<8x32xbf16>, vector<32x128xbf16>, vector<8x128xf32> -> vector<8x128xf32>
    %136 = arith.addf %133, %135 : vector<8x128xf32>
    %137 = vector.extract_strided_slice %136 {offsets = [0, 0], sizes = [8, 32], strides = [1, 1]} : vector<8x128xf32> to vector<8x32xf32>
    %138 = arith.negf %137 : vector<8x32xf32>
    %139 = math.exp %138 : vector<8x32xf32>
    %cst_53 = arith.constant 1.000000e+00 : f32
    %140 = vector.broadcast %cst_53 : f32 to vector<8x32xf32>
    %141 = arith.addf %140, %139 : vector<8x32xf32>
    %142 = arith.divf %140, %141 : vector<8x32xf32>
    %143 = vector.extract_strided_slice %136 {offsets = [0, 32], sizes = [8, 32], strides = [1, 1]} : vector<8x128xf32> to vector<8x32xf32>
    %144 = arith.negf %143 : vector<8x32xf32>
    %145 = math.exp %144 : vector<8x32xf32>
    %cst_54 = arith.constant 1.000000e+00 : f32
    %146 = vector.broadcast %cst_54 : f32 to vector<8x32xf32>
    %147 = arith.addf %146, %145 : vector<8x32xf32>
    %148 = arith.divf %146, %147 : vector<8x32xf32>
    %149 = vector.extract_strided_slice %136 {offsets = [0, 64], sizes = [8, 32], strides = [1, 1]} : vector<8x128xf32> to vector<8x32xf32>
    %150 = math.tanh %149 : vector<8x32xf32>
    %151 = vector.extract_strided_slice %136 {offsets = [0, 96], sizes = [8, 32], strides = [1, 1]} : vector<8x128xf32> to vector<8x32xf32>
    %152 = arith.negf %151 : vector<8x32xf32>
    %153 = math.exp %152 : vector<8x32xf32>
    %cst_55 = arith.constant 1.000000e+00 : f32
    %154 = vector.broadcast %cst_55 : f32 to vector<8x32xf32>
    %155 = arith.addf %154, %153 : vector<8x32xf32>
    %156 = arith.divf %154, %155 : vector<8x32xf32>
    %157 = arith.mulf %148, %128 : vector<8x32xf32>
    %158 = arith.mulf %142, %150 : vector<8x32xf32>
    %159 = arith.addf %157, %158 : vector<8x32xf32>
    %160 = math.tanh %159 : vector<8x32xf32>
    %161 = arith.mulf %156, %160 : vector<8x32xf32>
    %162 = arith.maximumf %64, %97 : vector<8x32xf32>
    %163 = arith.index_cast %c0_i32_31 : i32 to index
    %c0_56 = arith.constant 0 : index
    %c0_57 = arith.constant 0 : index
    %164 = vector.load %arg12[%163, %c0_56, %c0_57] : memref<2x8x32xf32, #tpu.memory_space<vmem>>, vector<1x8x32xf32>
    %165 = vector.shape_cast %164 : vector<1x8x32xf32> to vector<8x32xf32>
    %166 = vector.shape_cast %162 : vector<8x32xf32> to vector<1x8x32xf32>
    tpu.vector_store %arg12[%163, %c0_56, %c0_57], %166 {strides = array<i32>} : memref<2x8x32xf32, #tpu.memory_space<vmem>>, vector<1x8x32xf32>,
    %167 = arith.maximumf %130, %161 : vector<8x32xf32>
    %168 = arith.index_cast %27 : i32 to index
    %c0_58 = arith.constant 0 : index
    %c0_59 = arith.constant 0 : index
    %169 = vector.load %arg13[%168, %c0_58, %c0_59] : memref<2x8x32xf32, #tpu.memory_space<vmem>>, vector<1x8x32xf32>
    %170 = vector.shape_cast %169 : vector<1x8x32xf32> to vector<8x32xf32>
    %171 = vector.shape_cast %167 : vector<8x32xf32> to vector<1x8x32xf32>
    tpu.vector_store %arg13[%168, %c0_58, %c0_59], %171 {strides = array<i32>} : memref<2x8x32xf32, #tpu.memory_space<vmem>>, vector<1x8x32xf32>,
    %c1_i32_60 = arith.constant 1 : i32
    %c1_i32_61 = arith.constant 1 : i32
    %172 = arith.subi %c1_i32_61, %c1_i32_60 : i32
    %c2_i32_62 = arith.constant 2 : i32
    %173 = arith.muli %c2_i32_62, %c1_i32_60 : i32
    %c8_i32_63 = arith.constant 8 : i32
    %174 = arith.muli %173, %c8_i32_63 : i32
    %175 = tpu.assume_multiple %174, 16 : i32
    %c2_i32_64 = arith.constant 2 : i32
    %176 = arith.muli %c2_i32_64, %172 : i32
    %c8_i32_65 = arith.constant 8 : i32
    %177 = arith.muli %176, %c8_i32_65 : i32
    %178 = tpu.assume_multiple %177, 16 : i32
    %179 = arith.index_cast %175 : i32 to index
    %c0_66 = arith.constant 0 : index
    %180 = vector.load %arg14[%179, %c0_66] : memref<32x128xbf16, #tpu.memory_space<vmem>>, vector<8x128xbf16>
    %181 = arith.extf %180 : vector<8x128xbf16> to vector<8x128xf32>
    %182 = arith.truncf %97 : vector<8x32xf32> to vector<8x32xbf16>
    %cst_67 = arith.constant dense<0.000000e+00> : vector<8x128xf32>
    %183 = tpu.matmul %182, %21, %cst_67 {dimension_numbers = #tpu.dot_dimension_numbers<[1], [0], [0], [1], [0, 0, 1, 1], [], []>} : vector<8x32xbf16>, vector<32x128xbf16>, vector<8x128xf32> -> vector<8x128xf32>
    %184 = arith.addf %181, %183 : vector<8x128xf32>
    %185 = vector.extract_strided_slice %184 {offsets = [0, 0], sizes = [8, 32], strides = [1, 1]} : vector<8x128xf32> to vector<8x32xf32>
    %186 = arith.negf %185 : vector<8x32xf32>
    %187 = math.exp %186 : vector<8x32xf32>
    %cst_68 = arith.constant 1.000000e+00 : f32
    %188 = vector.broadcast %cst_68 : f32 to vector<8x32xf32>
    %189 = arith.addf %188, %187 : vector<8x32xf32>
    %190 = arith.divf %188, %189 : vector<8x32xf32>
    %191 = vector.extract_strided_slice %184 {offsets = [0, 32], sizes = [8, 32], strides = [1, 1]} : vector<8x128xf32> to vector<8x32xf32>
    %192 = arith.negf %191 : vector<8x32xf32>
    %193 = math.exp %192 : vector<8x32xf32>
    %cst_69 = arith.constant 1.000000e+00 : f32
    %194 = vector.broadcast %cst_69 : f32 to vector<8x32xf32>
    %195 = arith.addf %194, %193 : vector<8x32xf32>
    %196 = arith.divf %194, %195 : vector<8x32xf32>
    %197 = vector.extract_strided_slice %184 {offsets = [0, 64], sizes = [8, 32], strides = [1, 1]} : vector<8x128xf32> to vector<8x32xf32>
    %198 = math.tanh %197 : vector<8x32xf32>
    %199 = vector.extract_strided_slice %184 {offsets = [0, 96], sizes = [8, 32], strides = [1, 1]} : vector<8x128xf32> to vector<8x32xf32>
    %200 = arith.negf %199 : vector<8x32xf32>
    %201 = math.exp %200 : vector<8x32xf32>
    %cst_70 = arith.constant 1.000000e+00 : f32
    %202 = vector.broadcast %cst_70 : f32 to vector<8x32xf32>
    %203 = arith.addf %202, %201 : vector<8x32xf32>
    %204 = arith.divf %202, %203 : vector<8x32xf32>
    %205 = arith.mulf %196, %95 : vector<8x32xf32>
    %206 = arith.mulf %190, %198 : vector<8x32xf32>
    %207 = arith.addf %205, %206 : vector<8x32xf32>
    %208 = math.tanh %207 : vector<8x32xf32>
    %209 = arith.mulf %204, %208 : vector<8x32xf32>
    %c8_i32_71 = arith.constant 8 : i32
    %210 = arith.addi %175, %c8_i32_71 : i32
    %211 = tpu.assume_multiple %210, 8 : i32
    %212 = arith.index_cast %211 : i32 to index
    %c0_72 = arith.constant 0 : index
    %213 = vector.load %arg14[%212, %c0_72] : memref<32x128xbf16, #tpu.memory_space<vmem>>, vector<8x128xbf16>
    %214 = arith.extf %213 : vector<8x128xbf16> to vector<8x128xf32>
    %215 = arith.truncf %209 : vector<8x32xf32> to vector<8x32xbf16>
    %cst_73 = arith.constant dense<0.000000e+00> : vector<8x128xf32>
    %216 = tpu.matmul %215, %21, %cst_73 {dimension_numbers = #tpu.dot_dimension_numbers<[1], [0], [0], [1], [0, 0, 1, 1], [], []>} : vector<8x32xbf16>, vector<32x128xbf16>, vector<8x128xf32> -> vector<8x128xf32>
    %217 = arith.addf %214, %216 : vector<8x128xf32>
    %218 = vector.extract_strided_slice %217 {offsets = [0, 0], sizes = [8, 32], strides = [1, 1]} : vector<8x128xf32> to vector<8x32xf32>
    %219 = arith.negf %218 : vector<8x32xf32>
    %220 = math.exp %219 : vector<8x32xf32>
    %cst_74 = arith.constant 1.000000e+00 : f32
    %221 = vector.broadcast %cst_74 : f32 to vector<8x32xf32>
    %222 = arith.addf %221, %220 : vector<8x32xf32>
    %223 = arith.divf %221, %222 : vector<8x32xf32>
    %224 = vector.extract_strided_slice %217 {offsets = [0, 32], sizes = [8, 32], strides = [1, 1]} : vector<8x128xf32> to vector<8x32xf32>
    %225 = arith.negf %224 : vector<8x32xf32>
    %226 = math.exp %225 : vector<8x32xf32>
    %cst_75 = arith.constant 1.000000e+00 : f32
    %227 = vector.broadcast %cst_75 : f32 to vector<8x32xf32>
    %228 = arith.addf %227, %226 : vector<8x32xf32>
    %229 = arith.divf %227, %228 : vector<8x32xf32>
    %230 = vector.extract_strided_slice %217 {offsets = [0, 64], sizes = [8, 32], strides = [1, 1]} : vector<8x128xf32> to vector<8x32xf32>
    %231 = math.tanh %230 : vector<8x32xf32>
    %232 = vector.extract_strided_slice %217 {offsets = [0, 96], sizes = [8, 32], strides = [1, 1]} : vector<8x128xf32> to vector<8x32xf32>
    %233 = arith.negf %232 : vector<8x32xf32>
    %234 = math.exp %233 : vector<8x32xf32>
    %cst_76 = arith.constant 1.000000e+00 : f32
    %235 = vector.broadcast %cst_76 : f32 to vector<8x32xf32>
    %236 = arith.addf %235, %234 : vector<8x32xf32>
    %237 = arith.divf %235, %236 : vector<8x32xf32>
    %238 = arith.mulf %229, %207 : vector<8x32xf32>
    %239 = arith.mulf %223, %231 : vector<8x32xf32>
    %240 = arith.addf %238, %239 : vector<8x32xf32>
    %241 = math.tanh %240 : vector<8x32xf32>
    %242 = arith.mulf %237, %241 : vector<8x32xf32>
    %c8_i32_77 = arith.constant 8 : i32
    %243 = arith.addi %178, %c8_i32_77 : i32
    %244 = tpu.assume_multiple %243, 8 : i32
    %245 = arith.index_cast %244 : i32 to index
    %c0_78 = arith.constant 0 : index
    %246 = vector.load %arg15[%245, %c0_78] : memref<32x128xbf16, #tpu.memory_space<vmem>>, vector<8x128xbf16>
    %247 = arith.extf %246 : vector<8x128xbf16> to vector<8x128xf32>
    %248 = arith.truncf %161 : vector<8x32xf32> to vector<8x32xbf16>
    %cst_79 = arith.constant dense<0.000000e+00> : vector<8x128xf32>
    %249 = tpu.matmul %248, %22, %cst_79 {dimension_numbers = #tpu.dot_dimension_numbers<[1], [0], [0], [1], [0, 0, 1, 1], [], []>} : vector<8x32xbf16>, vector<32x128xbf16>, vector<8x128xf32> -> vector<8x128xf32>
    %250 = arith.addf %247, %249 : vector<8x128xf32>
    %251 = vector.extract_strided_slice %250 {offsets = [0, 0], sizes = [8, 32], strides = [1, 1]} : vector<8x128xf32> to vector<8x32xf32>
    %252 = arith.negf %251 : vector<8x32xf32>
    %253 = math.exp %252 : vector<8x32xf32>
    %cst_80 = arith.constant 1.000000e+00 : f32
    %254 = vector.broadcast %cst_80 : f32 to vector<8x32xf32>
    %255 = arith.addf %254, %253 : vector<8x32xf32>
    %256 = arith.divf %254, %255 : vector<8x32xf32>
    %257 = vector.extract_strided_slice %250 {offsets = [0, 32], sizes = [8, 32], strides = [1, 1]} : vector<8x128xf32> to vector<8x32xf32>
    %258 = arith.negf %257 : vector<8x32xf32>
    %259 = math.exp %258 : vector<8x32xf32>
    %cst_81 = arith.constant 1.000000e+00 : f32
    %260 = vector.broadcast %cst_81 : f32 to vector<8x32xf32>
    %261 = arith.addf %260, %259 : vector<8x32xf32>
    %262 = arith.divf %260, %261 : vector<8x32xf32>
    %263 = vector.extract_strided_slice %250 {offsets = [0, 64], sizes = [8, 32], strides = [1, 1]} : vector<8x128xf32> to vector<8x32xf32>
    %264 = math.tanh %263 : vector<8x32xf32>
    %265 = vector.extract_strided_slice %250 {offsets = [0, 96], sizes = [8, 32], strides = [1, 1]} : vector<8x128xf32> to vector<8x32xf32>
    %266 = arith.negf %265 : vector<8x32xf32>
    %267 = math.exp %266 : vector<8x32xf32>
    %cst_82 = arith.constant 1.000000e+00 : f32
    %268 = vector.broadcast %cst_82 : f32 to vector<8x32xf32>
    %269 = arith.addf %268, %267 : vector<8x32xf32>
    %270 = arith.divf %268, %269 : vector<8x32xf32>
    %271 = arith.mulf %262, %159 : vector<8x32xf32>
    %272 = arith.mulf %256, %264 : vector<8x32xf32>
    %273 = arith.addf %271, %272 : vector<8x32xf32>
    %274 = math.tanh %273 : vector<8x32xf32>
    %275 = arith.mulf %270, %274 : vector<8x32xf32>
    %276 = arith.index_cast %178 : i32 to index
    %c0_83 = arith.constant 0 : index
    %277 = vector.load %arg15[%276, %c0_83] : memref<32x128xbf16, #tpu.memory_space<vmem>>, vector<8x128xbf16>
    %278 = arith.extf %277 : vector<8x128xbf16> to vector<8x128xf32>
    %279 = arith.truncf %275 : vector<8x32xf32> to vector<8x32xbf16>
    %cst_84 = arith.constant dense<0.000000e+00> : vector<8x128xf32>
    %280 = tpu.matmul %279, %22, %cst_84 {dimension_numbers = #tpu.dot_dimension_numbers<[1], [0], [0], [1], [0, 0, 1, 1], [], []>} : vector<8x32xbf16>, vector<32x128xbf16>, vector<8x128xf32> -> vector<8x128xf32>
    %281 = arith.addf %278, %280 : vector<8x128xf32>
    %282 = vector.extract_strided_slice %281 {offsets = [0, 0], sizes = [8, 32], strides = [1, 1]} : vector<8x128xf32> to vector<8x32xf32>
    %283 = arith.negf %282 : vector<8x32xf32>
    %284 = math.exp %283 : vector<8x32xf32>
    %cst_85 = arith.constant 1.000000e+00 : f32
    %285 = vector.broadcast %cst_85 : f32 to vector<8x32xf32>
    %286 = arith.addf %285, %284 : vector<8x32xf32>
    %287 = arith.divf %285, %286 : vector<8x32xf32>
    %288 = vector.extract_strided_slice %281 {offsets = [0, 32], sizes = [8, 32], strides = [1, 1]} : vector<8x128xf32> to vector<8x32xf32>
    %289 = arith.negf %288 : vector<8x32xf32>
    %290 = math.exp %289 : vector<8x32xf32>
    %cst_86 = arith.constant 1.000000e+00 : f32
    %291 = vector.broadcast %cst_86 : f32 to vector<8x32xf32>
    %292 = arith.addf %291, %290 : vector<8x32xf32>
    %293 = arith.divf %291, %292 : vector<8x32xf32>
    %294 = vector.extract_strided_slice %281 {offsets = [0, 64], sizes = [8, 32], strides = [1, 1]} : vector<8x128xf32> to vector<8x32xf32>
    %295 = math.tanh %294 : vector<8x32xf32>
    %296 = vector.extract_strided_slice %281 {offsets = [0, 96], sizes = [8, 32], strides = [1, 1]} : vector<8x128xf32> to vector<8x32xf32>
    %297 = arith.negf %296 : vector<8x32xf32>
    %298 = math.exp %297 : vector<8x32xf32>
    %cst_87 = arith.constant 1.000000e+00 : f32
    %299 = vector.broadcast %cst_87 : f32 to vector<8x32xf32>
    %300 = arith.addf %299, %298 : vector<8x32xf32>
    %301 = arith.divf %299, %300 : vector<8x32xf32>
    %302 = arith.mulf %293, %273 : vector<8x32xf32>
    %303 = arith.mulf %287, %295 : vector<8x32xf32>
    %304 = arith.addf %302, %303 : vector<8x32xf32>
    %305 = math.tanh %304 : vector<8x32xf32>
    %306 = arith.mulf %301, %305 : vector<8x32xf32>
    %307 = arith.maximumf %209, %242 : vector<8x32xf32>
    %308 = arith.index_cast %c1_i32_60 : i32 to index
    %c0_88 = arith.constant 0 : index
    %c0_89 = arith.constant 0 : index
    %309 = vector.load %arg12[%308, %c0_88, %c0_89] : memref<2x8x32xf32, #tpu.memory_space<vmem>>, vector<1x8x32xf32>
    %310 = vector.shape_cast %309 : vector<1x8x32xf32> to vector<8x32xf32>
    %311 = vector.shape_cast %307 : vector<8x32xf32> to vector<1x8x32xf32>
    tpu.vector_store %arg12[%308, %c0_88, %c0_89], %311 {strides = array<i32>} : memref<2x8x32xf32, #tpu.memory_space<vmem>>, vector<1x8x32xf32>,
    %312 = arith.maximumf %275, %306 : vector<8x32xf32>
    %313 = arith.index_cast %172 : i32 to index
    %c0_90 = arith.constant 0 : index
    %c0_91 = arith.constant 0 : index
    %314 = vector.load %arg13[%313, %c0_90, %c0_91] : memref<2x8x32xf32, #tpu.memory_space<vmem>>, vector<1x8x32xf32>
    %315 = vector.shape_cast %314 : vector<1x8x32xf32> to vector<8x32xf32>
    %316 = vector.shape_cast %312 : vector<8x32xf32> to vector<1x8x32xf32>
    tpu.vector_store %arg13[%313, %c0_90, %c0_91], %316 {strides = array<i32>} : memref<2x8x32xf32, #tpu.memory_space<vmem>>, vector<1x8x32xf32>,
    %c2_i32_92 = arith.constant 2 : i32
    %c0_93 = arith.constant 0 : index
    %c0_94 = arith.constant 0 : index
    %317 = vector.load %arg16[%c0_93, %c0_94] : memref<8x32xf32, #tpu.memory_space<vmem>>, vector<8x32xf32>
    tpu.vector_store %arg16[%c0_93, %c0_94], %242 {strides = array<i32>} : memref<8x32xf32, #tpu.memory_space<vmem>>, vector<8x32xf32>,
    %c0_95 = arith.constant 0 : index
    %c0_96 = arith.constant 0 : index
    %318 = vector.load %arg17[%c0_95, %c0_96] : memref<8x32xf32, #tpu.memory_space<vmem>>, vector<8x32xf32>
    tpu.vector_store %arg17[%c0_95, %c0_96], %240 {strides = array<i32>} : memref<8x32xf32, #tpu.memory_space<vmem>>, vector<8x32xf32>,
    %c0_97 = arith.constant 0 : index
    %c0_98 = arith.constant 0 : index
    %319 = vector.load %arg18[%c0_97, %c0_98] : memref<8x32xf32, #tpu.memory_space<vmem>>, vector<8x32xf32>
    tpu.vector_store %arg18[%c0_97, %c0_98], %306 {strides = array<i32>} : memref<8x32xf32, #tpu.memory_space<vmem>>, vector<8x32xf32>,
    %c0_99 = arith.constant 0 : index
    %c0_100 = arith.constant 0 : index
    %320 = vector.load %arg19[%c0_99, %c0_100] : memref<8x32xf32, #tpu.memory_space<vmem>>, vector<8x32xf32>
    tpu.vector_store %arg19[%c0_99, %c0_100], %304 {strides = array<i32>} : memref<8x32xf32, #tpu.memory_space<vmem>>, vector<8x32xf32>,
    return
  }
  func.func @transform_0(%arg0: i32, %arg1: i32) -> (i32, i32, i32) {
    %c0_i32 = arith.constant 0 : i32
    %c0_i32_0 = arith.constant 0 : i32
    return %arg1, %arg0, %c0_i32 : i32, i32, i32
  }
  func.func @transform_1(%arg0: i32, %arg1: i32) -> (i32, i32, i32) {
    %c2_i32 = arith.constant 2 : i32
    %0 = arith.subi %c2_i32, %arg1 : i32
    %c0_i32 = arith.constant 0 : i32
    %c0_i32_0 = arith.constant 0 : i32
    return %0, %arg0, %c0_i32 : i32, i32, i32
  }
  func.func @transform_2(%arg0: i32, %arg1: i32) -> (i32, i32) {
    %c0_i32 = arith.constant 0 : i32
    %c0_i32_0 = arith.constant 0 : i32
    return %arg0, %c0_i32 : i32, i32
  }
  func.func @transform_3(%arg0: i32, %arg1: i32) -> (i32, i32) {
    %c0_i32 = arith.constant 0 : i32
    %c0_i32_0 = arith.constant 0 : i32
    return %arg0, %c0_i32 : i32, i32
  }
  func.func @transform_4(%arg0: i32, %arg1: i32) -> (i32, i32) {
    %c0_i32 = arith.constant 0 : i32
    %c0_i32_0 = arith.constant 0 : i32
    %c0_i32_1 = arith.constant 0 : i32
    return %c0_i32, %c0_i32_0 : i32, i32
  }
  func.func @transform_5(%arg0: i32, %arg1: i32) -> (i32, i32) {
    %c0_i32 = arith.constant 0 : i32
    %c0_i32_0 = arith.constant 0 : i32
    %c0_i32_1 = arith.constant 0 : i32
    return %c0_i32, %c0_i32_0 : i32, i32
  }
  func.func @transform_6(%arg0: i32, %arg1: i32) -> (i32, i32) {
    %c0_i32 = arith.constant 0 : i32
    %c0_i32_0 = arith.constant 0 : i32
    %c0_i32_1 = arith.constant 0 : i32
    return %c0_i32, %c0_i32_0 : i32, i32
  }
  func.func @transform_7(%arg0: i32, %arg1: i32) -> (i32, i32) {
    %c0_i32 = arith.constant 0 : i32
    %c0_i32_0 = arith.constant 0 : i32
    %c0_i32_1 = arith.constant 0 : i32
    return %c0_i32, %c0_i32_0 : i32, i32
  }
  func.func @transform_8(%arg0: i32, %arg1: i32) -> (i32, i32) {
    %c0_i32 = arith.constant 0 : i32
    %c0_i32_0 = arith.constant 0 : i32
    %c0_i32_1 = arith.constant 0 : i32
    return %c0_i32, %c0_i32_0 : i32, i32
  }
  func.func @transform_9(%arg0: i32, %arg1: i32) -> (i32, i32) {
    %c0_i32 = arith.constant 0 : i32
    %c0_i32_0 = arith.constant 0 : i32
    %c0_i32_1 = arith.constant 0 : i32
    return %c0_i32, %c0_i32_0 : i32, i32
  }
  func.func @transform_10(%arg0: i32, %arg1: i32) -> (i32, i32, i32) {
    %c0_i32 = arith.constant 0 : i32
    %c0_i32_0 = arith.constant 0 : i32
    return %arg1, %arg0, %c0_i32 : i32, i32, i32
  }
  func.func @transform_11(%arg0: i32, %arg1: i32) -> (i32, i32, i32) {
    %c2_i32 = arith.constant 2 : i32
    %0 = arith.subi %c2_i32, %arg1 : i32
    %c0_i32 = arith.constant 0 : i32
    %c0_i32_0 = arith.constant 0 : i32
    return %0, %arg0, %c0_i32 : i32, i32, i32
  }
}

</mosaic_0001>

<bundles_post_ra>
// kernel: tpu_custom_call.1
= control target key start
LH: loop header
LB: loop body
LE: loop exit
PB: predicated region body
PF: predicated region fallthrough
CT: control target
= control target key end

     0   :  { %s2825_s0 = inlined_call_operand.vmem [shape: bf16[12,16,8], index: 0, kind: input, shape index: {}]   ;;  %s2826_s1 = inlined_call_operand.vmem [shape: bf16[12,16,8], index: 1, kind: input, shape index: {}]   ;;  %s2827_s2 = inlined_call_operand.vmem [shape: f32[16,32], index: 2, kind: input, shape index: {}]   ;;  %s2828_s3 = inlined_call_operand.vmem [shape: f32[16,32], index: 3, kind: input, shape index: {}]   ;;  %s2829_s4 = inlined_call_operand.vmem [shape: bf16[8,128], index: 4, kind: input, shape index: {}]   ;;  %s2830_s5 = inlined_call_operand.vmem [shape: bf16[8,128], index: 5, kind: input, shape index: {}]   ;;  %s2831_s6 = inlined_call_operand.vmem [shape: bf16[32,128], index: 6, kind: input, shape index: {}]   ;;  %s2832_s7 = inlined_call_operand.vmem [shape: bf16[32,128], index: 7, kind: input, shape index: {}]   ;;  %s2833_s8 = inlined_call_operand.vmem [shape: f32[1,128], index: 8, kind: input, shape index: {}]   ;;  %s2834_s9 = inlined_call_operand.vmem [shape: f32[1,128], index: 9, kind: input, shape index: {}]   ;;  %s2835_s10 = inlined_call_operand.hbm [shape: f32[6,16,32], index: 10, kind: output, shape index: {0}]   ;;  %s2836_s11 = inlined_call_operand.hbm [shape: f32[6,16,32], index: 11, kind: output, shape index: {1}]  }
   0x1   :  { %2848 = sst [smem:[#allocation22_spill]] %s2825_s0 }
   0x2   :  { %2849 = sst [smem:[#allocation23_spill]] %s2826_s1 }
   0x3   :  { %2850 = sst [smem:[#allocation24_spill]] %s2827_s2 }
   0x4   :  { %2851 = sst [smem:[#allocation25_spill]] %s2830_s5 }
   0x5   :  { %2852 = sst [smem:[#allocation26_spill]] %s2831_s6 }
   0x6   :  { %2853 = sst [smem:[#allocation27_spill]] %s2832_s7 }
   0x7   :  { %2854 = sst [smem:[#allocation28_spill]] %s2833_s8 }
   0x8   :  { %2855 = sst [smem:[#allocation29_spill]] %s2834_s9 }
   0x9   :  { %2856 = sst [smem:[#allocation30_spill]] %s2835_s10 }
   0xa   :  { %2857 = sst [smem:[#allocation31_spill]] %s2836_s11 }
   0xb   :  { %17 = vsyncpa [#allocation11], 0 }
   0xc   :  { %19 = vsyncpa [#allocation11 + $0x1], 0 }
   0xd   :  { %20 = vsyncpa [#allocation13], 0 }
   0xe   :  { %22 = vsyncpa [#allocation13 + $0x1], 0  ;;  %s2325_s17 = smov 0   ;;  %s2327_s18 = smov 0  }
   0xf   :  { %s2329_s19 = smov 0   ;;  %s2331_s20 = smov 0  }
  0x10   :  { %s2333_s21 = smov 0   ;;  %s2335_s22 = smov 0  }
  0x11   :  { %s2337_s23 = smov 0   ;;  %s2339_s24 = smov 0  }
  0x12   :  { %s2341_s25 = smov 0   ;;  %s2343_s26 = smov 0  }
  0x13   :  { %s2345_s27 = smov 0  }
  0x14 LB: > { %2858 = sst [smem:[#allocation16_spill]] %s2244_s25  ;;  %s1713_s28 = sadd.s32 4294967295, %s2252_s27   ;;  %s2252_s27 = sphi %s2345_s27, %s28_s27   ;;  %s2248_s26 = sphi %s2343_s26, %s2889_s26   ;;  %s2244_s25 = sphi %s2341_s25, %s2888_s25   ;;  %s2240_s24 = sphi %s2339_s24, %s2887_s24   ;;  %s2236_s23 = sphi %s2337_s23, %s2886_s23   ;;  %s2232_s22 = sphi %s2335_s22, %s2895_s22   ;;  %s2228_s21 = sphi %s2333_s21, %s2894_s21   ;;  %s2224_s20 = sphi %s2331_s20, %s2893_s20   ;;  %s2220_s19 = sphi %s2329_s19, %s2892_s19   ;;  %s2216_s18 = sphi %s2327_s18, %s2891_s18   ;;  %s2212_s17 = sphi %s2325_s17, %s2890_s17  }
  0x15   : > { %2859 = sst [smem:[#allocation17_spill]] %s2248_s26  ;;  %s37_s30 = sadd.s32 1, %s2244_s25 }
  0x16   : > { %s40_s12 = sadd.s32 1, %s2248_s26  ;;  %p38_p0 = scmp.ge.s32.totalorder %s37_s30, 3 }
  0x17   : > { %s49_s13 = sadd.s32 1, %s2232_s22  ;;  %p56_p1 = scmp.ne.s32.totalorder %s2232_s22, %s2228_s21 }
  0x18   : > { %p57_p2 = scmp.eq.s32.totalorder %s2252_s27, 0  ;;  %s2897_s30 = smov (%p38_p0, %s37_s30), 0 }
  0x19   : > { %2860 = sst [smem:[#allocation18_spill]] %s2897_s30  ;;  %s2899_s12 = smov (!%p38_p0, %s40_s12), %s2248_s26 }
  0x1a   : > { %s44_s14 = ssub.s32 %s2244_s25, %s2897_s30  ;;  %p2398_p3 = por %p57_p2, %p56_p1 }
  0x1b   : > { %p42_p4 = scmp.ge.s32.totalorder %s2899_s12, 2  ;;  %s2842_s16 = ssub.s32 2, %s2244_s25 }
  0x1c   : > { %s73_s29 = ssub.s32 2, %s2897_s30  ;;  %s79_s11 = sadd.s32 1, %s2224_s20 }
  0x1d   : > { %s2901_s12 = smov (%p42_p4, %s2899_s12), 0  ;;  %s74_s10 = ssub.s32 %s2842_s16, %s73_s29 }
  0x1e   : > { %2862 = sst [smem:[#allocation19_spill]] %s2901_s12  ;;  %p86_p5 = scmp.ne.s32.totalorder %s2224_s20, %s2220_s19 }
  0x1f   : > { %s45_s9 = ssub.s32 %s2248_s26, %s2901_s12  ;;  %p296_p6 = scmp.eq.s32.totalorder %s1713_s28, 5 }
  0x20   : > { %s46_s8 = sor.u32 %s45_s9, %s44_s14  ;;  %s76_s7 = sor.u32 %s74_s10, %s45_s9 }
  0x21   : > { %p47_p7 = scmp.eq.s32.totalorder %s46_s8, 0  ;;  %p77_p8 = scmp.eq.s32.totalorder %s76_s7, 0 }
  0x22   : > { %p2418_p9 = por %p86_p5, %p57_p2  ;;  %p2425_p10 = por %p296_p6, %p56_p1 }
  0x23   : > { %s2430_s5 = scalar_select %p47_p7, %s2232_s22, %s49_s13  }
  0x24   : > { %s2433_s29 = scalar_select %p77_p8, %s2224_s20, %s79_s11  }
  0x25   : > { %2865 = sst [smem:[#allocation20_spill]] %s2430_s5  ;;  %p301_p11 = scmp.ne.s32.totalorder %s2228_s21, %s2216_s18 }
  0x26   : > { %2866 = sst [smem:[#allocation21_spill]] %s2433_s29  ;;  %s2867_s28 = sadd.s32 4294967294, %s2252_s27  }
  0x27   : > { %p302_p12 = scmp.eq.s32.totalorder %s2867_s28, 5  ;;  %p2442_p13 = por %p296_p6, %p86_p5 }
  0x28   : > { %p331_p0 = scmp.ne.s32.totalorder %s2220_s19, %s2212_s17  ;;  %p1716_p4 = scmp.ge.s32.totalorder %s2252_s27, 6 }
  0x29   : > { %p2448_p2 = por %p302_p12, %p301_p11 }
  0x2a   : > { %p2452_p1 = por %p331_p0, %p302_p12  ;;  %366 = sbr.rel (%p1716_p4) target bundleno = 71 (0x47), region = 40 }
  0x2f   : > { %369 = sbr.rel (!%p2398_p3) target bundleno = 59 (0x3b), region = 44  ;;  %s371_s10 = sand.u32 (%p2398_p3), 1, %s2232_s22  }
  0x30   : > { %s1783_s11 = sshll.u32 (%p2398_p3), %s2244_s25, 3  ;;  %s1717_s13 = sshll.u32 (%p2398_p3), %s371_s10, 4 }
  0x31   : > { %s376_s14 = sadd.s32 (%p2398_p3), %s2248_s26, %s1783_s11  ;;  %s2871_s0 = sld [smem:[#allocation22_spill]] (%p2398_p3) }
  0x32   : > { %s1720_s28 = sshll.u32 (%p2398_p3), %s376_s14, 2  ;;  %s373_s29 = scalar_lea.vmem (%p2398_p3), [#allocation8], %s1717_s13 }
  0x37   : > { %s378_s5 = scalar_lea.vmem %s2871_s0, %s1720_s28 }
  0x38   : > { %v395_v0 = vld [vmem:[%s378_s5] sm:$0xf]  ;;  %v397_v1 = vld [vmem:[%s378_s5 + $0x8] sm:$0xf]  ;;  %v399_v2 = vld [vmem:[%s378_s5 + $0x10] sm:$0xf] }
  0x39   : > { %396 = vst [vmem:[%s373_s29] sm:$0xf] %v395_v0  ;;  %398 = vst [vmem:[%s373_s29 + $0x4] sm:$0xf] %v397_v1  ;;  %v401_v3 = vld [vmem:[%s378_s5 + $0x18] sm:$0xf] }
  0x3a   : > { %400 = vst [vmem:[%s373_s29 + $0x8] sm:$0xf] %v399_v2  ;;  %402 = vst [vmem:[%s373_s29 + $0xc] sm:$0xf] %v401_v3 }
  0x3b PF: > { %434 = sbr.rel (!%p2418_p9) target bundleno = 71 (0x47), region = 85  ;;  %s436_s15 = sand.u32 (%p2418_p9), 1, %s2224_s20  }
  0x3c   : > { %s2872_s10 = ssub.s32 (%p2418_p9), 2, %s2244_s25  ;;  %s1721_s16 = sshll.u32 (%p2418_p9), %s436_s15, 4 }
  0x3d   : > { %s1784_s12 = sshll.u32 (%p2418_p9), %s2872_s10, 3  ;;  %s2873_s1 = sld [smem:[#allocation23_spill]] (%p2418_p9) }
  0x3e   : > { %s442_s11 = sadd.s32 (%p2418_p9), %s2248_s26, %s1784_s12  ;;  %s438_s5 = scalar_lea.vmem (%p2418_p9), [#allocation9], %s1721_s16 }
  0x3f   : > { %s1724_s14 = sshll.u32 (%p2418_p9), %s442_s11, 2 }
  0x43   : > { %s444_s0 = scalar_lea.vmem %s2873_s1, %s1724_s14 }
  0x44   : > { %v461_v4 = vld [vmem:[%s444_s0] sm:$0xf]  ;;  %v463_v5 = vld [vmem:[%s444_s0 + $0x8] sm:$0xf]  ;;  %v465_v6 = vld [vmem:[%s444_s0 + $0x10] sm:$0xf] }
  0x45   : > { %462 = vst [vmem:[%s438_s5] sm:$0xf] %v461_v4  ;;  %464 = vst [vmem:[%s438_s5 + $0x4] sm:$0xf] %v463_v5  ;;  %v467_v7 = vld [vmem:[%s444_s0 + $0x18] sm:$0xf] }
  0x46   : > { %466 = vst [vmem:[%s438_s5 + $0x8] sm:$0xf] %v465_v6  ;;  %468 = vst [vmem:[%s438_s5 + $0xc] sm:$0xf] %v467_v7 }
  0x47 PF: > { %p1725_p3 = scmp.ge.s32.totalorder %s2252_s27, 1  ;;  %p513_p5 = scmp.lt.s32.totalorder %s2252_s27, 7 }
  0x49   : > { %p514_p6 = pnand %p1725_p3, %p513_p5 }
  0x4a   : > { %s2844_s30 = sand.u32 (!%p514_p6), 1, %s2228_s21   ;;  %s2847_s29 = sand.u32 (!%p514_p6), 1, %s2220_s19  }
  0x4b   : > { %517 = sbr.rel (%p514_p6) target bundleno = 2920 (0xb68), region = 134  ;;  %s2480_s15 = sshll.u32 (!%p514_p6), %s2844_s30, 4 }
  0x4c   : > { %s2484_s0 = sshll.u32 (!%p514_p6), %s2847_s29, 4  ;;  %p586_p7 = scmp.lt.s32.totalorder (!%p514_p6), %s2240_s24, 1 }
  0x4d   : > { %s2874_s2 = sld [smem:[#allocation24_spill]] (!%p514_p6)  ;;  %s522_s30 = scalar_lea.vmem (!%p514_p6), [#allocation8], %s2480_s15 }
  0x4e   : > { %s529_s1 = scalar_lea.vmem (!%p514_p6), [#allocation9], %s2484_s0  ;;  %s2497_s26 = scalar_lea.vmem (!%p514_p6), [#allocation10], %s2480_s15 }
  0x4f   : > { %s2500_s25 = scalar_lea.vmem (!%p514_p6), [#allocation12], %s2484_s0  ;;  %p1732_p8 = scmp.ne.s32.totalorder (!%p514_p6), %s2236_s23, 0 }
  0x50   : > { %s587_s10 = scalar_select %p586_p7, %s2240_s24, 1 }
  0x51   : > { %601 = sbr.rel (%p1732_p8) target bundleno = 89 (0x59), region = 146 }
  0x52   : > { %s1730_s12 = sshll.u32 %s587_s10, 3 }
  0x53   : > { %s589_s14 = scalar_lea.vmem %s2874_s2, %s1730_s12  ;;  %s593_s5 = scalar_lea.vmem %s2828_s3, %s1730_s12 }
  0x56   : > { %vm602_vm0 = vcmask 261120   ;;  %v605_v8 = vld [vmem:[%s589_s14] sm:$0xff]  ;;  %v2254_v10 = vmov 0.0  }
  0x57   : > { %v607_v9 = vld [vmem:[%s593_s5] sm:$0xff]  ;;  %603 = vst.msk [vmem:[#allocation4] sm:$0xff] %vm602_vm0, %v2254_v10  ;;  %604 = vst.msk [vmem:[#allocation5] sm:$0xff] %vm602_vm0, %v2254_v10 }
  0x58   : > { %606 = vst.msk [vmem:[#allocation6] sm:$0xff] %vm602_vm0, %v605_v8  ;;  %608 = vst.msk [vmem:[#allocation7] sm:$0xff] %vm602_vm0, %v607_v9 }
  0x59 PF: > { %v617_v11 = vld [vmem:[%s2829_s4] sm:$0xf]  ;;  %vm642_vm1 = vcmask 1043456   ;;  %vm635_vm2 = vcmask 64512   ;;  %v2035_v14 = vld [vmem:[%s522_s30 + $0x8] sm:$0xff]   ;;  %s2875_s16 = sld [smem:[#allocation25_spill]] }
  0x5a   : > { %v2034_v12 = vld [vmem:[%s522_s30] sm:$0xff]   ;;  %1923 = vmatprep.subr.msk.bf16.mxu0 %vm642_vm1, %v617_v11  ;;  %v644_v13 = vsel %vm642_vm1, %v617_v11, 0  ;;  %v2255_v18 = vmov 0.0   ;;  %v2037_v19 = vld [vmem:[%s529_s1 + $0x8] sm:$0xff]   ;;  %s2876_s28 = sld [smem:[#allocation26_spill]]  ;;  %vm2256_vm3 = vmmov 0  }
  0x5b   : > { %1848 = vmatpush3.bf16.msra.mxu0 %v644_v13  ;;  %1849 = vmatprep.mubr.msk.bf16.mxu0 %vm635_vm2, %v2034_v12  ;;  %v2036_v17 = vld [vmem:[%s529_s1] sm:$0xff]   ;;  %s2257_s1 = smov 32   ;;  %vm838_vm4 = vcmask 261120   ;;  %s2877_s12 = sld [smem:[#allocation27_spill]] }
  0x5c   : > { %1859 = vmatprep.subr.bf16.mxu0 %v2255_v18  ;;  %1855 = vmatprep.mubr.msk.bf16.mxu1 %vm635_vm2, %v2036_v17  ;;  %s2878_s14 = sld [smem:[#allocation28_spill]]  ;;  %s2258_s10 = smov 64  }
  0x5d   : > { %s2879_s5 = sld [smem:[#allocation29_spill]]  ;;  %s2259_s15 = smov 96  }
  0x5e   : > { %1850 = vmatmul.mubr.msk.bf16.vlgmr.msra.gmra.mxu0 %vm635_vm2, %v2035_v14  ;;  %v819_v22 = vld [vmem:[#allocation4] sm:$0xff]  ;;  %v820_v23 = vld [vmem:[#allocation5] sm:$0xff]  ;;  %s1793_s0 = sshll.u32 %s2236_s23, 2  ;;  %s1525_s13 = sshll.u32 %s2497_s26, 4  ;;  %s2711_s13 = int_to_ptr.vmem [resolvable:$true] %s1525_s13 }
  0x5f   : > { %v715_v15 = vld [vmem:[%s2875_s16] sm:$0xf]  ;;  %1863 = vmatprep.mubr.msk.bf16.mxu0 %vm2256_vm3, %v2255_v18  ;;  %v825_v24 = vpack.c.bf16 %v819_v22, %v819_v22  ;;  %891 = vrot.lane.b32.xlu1 %v820_v23, %s2257_s1  ;;  %v821_v27 = vld [vmem:[#allocation6] sm:$0xff]  ;;  %v822_v3 = vld [vmem:[#allocation7] sm:$0xff]  ;;  %s1535_s16 = ssub.s32 2, %s2236_s23  ;;  %s1522_s11 = sadd.s32 %s2240_s24, %s1793_s0 }
  0x60   : > { %1924 = vmatprep.subr.msk.bf16.mxu1 %vm642_vm1, %v715_v15  ;;  %v740_v16 = vsel %vm642_vm1, %v715_v15, 0  ;;  %v2516_v20 = vld [vmem:[%s2876_s28 + $0x8] sm:$0xff]   ;;  %v2521_v21 = vld [vmem:[%s2876_s28] sm:$0xff]   ;;  %v997_v28 = vpack.c.bf16 %v821_v27, %v821_v27  ;;  %s1777_s30 = sshll.u32 %s1522_s11, 7  ;;  %s2880_s29 = sld [smem:[#allocation30_spill]] }
  0x61   : > { %1854 = vmatpush3.bf16.msra.mxu1 %v740_v16  ;;  %1860 = vmatpush3.bf16.msra.mxu0 %v2516_v20  ;;  %v2538_v25 = vld [vmem:[%s2877_s12 + $0x8] sm:$0xff]   ;;  %v2548_v26 = vld [vmem:[%s2877_s12] sm:$0xff]   ;;  %s2881_s0 = sand.u32 1, %s2228_s21   ;;  %s2260_s11 = smov [#allocation10]  }
  0x62   : > { %1867 = vmatprep.subr.bf16.mxu1 %v2255_v18  ;;  %1861 = vmatprep.subr.bf16.mxu0 %v2255_v18  ;;  %v1733_v30 = vld [vmem:[%s2878_s14] ss:$0 sm:$0xff]  ;;  %s1794_s14 = sshll.u32 %s1535_s16, 2  ;;  %s2106_s16 = scalar_lea.vmem %s2711_s13, 256 }
  0x63   : > { %v1742_v33 = vld [vmem:[%s2879_s5] ss:$0 sm:$0xff]  ;;  %s1541_s5 = sadd.s32 %s2240_s24, %s1794_s14  ;;  %s2720_s24 = scalar_lea.sflag [#allocation11], %s2881_s0 }
  0x64   : > { %1856 = vmatmul.mubr.msk.bf16.vlgmr.msra.gmra.mxu1 %vm635_vm2, %v2037_v19  ;;  %s2715_s23 = sshll.u32 %s1541_s5, 7  ;;  %p2107_p9 = scmp.ne.s32.totalorder %s2711_s13, %s2106_s16 }
  0x65   : > { %1868 = vmatpush3.bf16.msra.mxu1 %v2516_v20  ;;  %1871 = vmatprep.mubr.msk.bf16.mxu1 %vm2256_vm3, %v2255_v18  ;;  %s2110_s14 = sshll.u32 %s2260_s11, 4  ;;  %s2111_s14 = int_to_ptr.vmem [resolvable:$false] %s2110_s14 }
  0x66   : > { %1869 = vmatprep.subr.bf16.mxu1 %v2255_v18  ;;  %1862 = vmatpush3.bf16.msra.mxu0 %v2521_v21  ;;  %s2709_s2 = scalar_lea.hbm %s2880_s29, %s1777_s30  ;;  %p2108_p11 = pnand %p2107_p9, %p2425_p10 }
  0x67   : > { %1875 = vmatprep.subr.bf16.mxu0 %v2255_v18  ;;  %s2112_s30 = scalar_lea.vmem %s2111_s14, 512  ;;  %p2113_p0 = scmp.lt.s32.totalorder %s2711_s13, %s2111_s14 }
  0x68   : > { %p2109_p12 = pneg %p2108_p11  ;;  %p2114_p4 = scmp.lt.s32.totalorder %s2112_s30, %s2106_s16 }
  0x69   : > { %1870 = vmatpush3.bf16.msra.mxu1 %v2521_v21  ;;  %1864 = vmatmul.mubr.msk.bf16.vlgmr.msra.gmra.mxu0 %vm838_vm4, %v825_v24 }
  0x6a   : > { %1883 = vmatprep.subr.bf16.mxu1 %v2255_v18  ;;  %1876 = vmatpush3.bf16.msra.mxu0 %v2538_v25  ;;  %p2115_p3 = por %p2114_p4, %p2113_p0 }
  0x6b   : > { %1879 = vmatprep.mubr.msk.bf16.mxu0 %vm2256_vm3, %v2255_v18  ;;  %1877 = vmatprep.subr.bf16.mxu0 %v2255_v18 }
  0x6c   : > { %p2116_p5 = pnand %p2115_p3, %p2109_p12 }
  0x6e   : > { %1878 = vmatpush3.bf16.msra.mxu0 %v2548_v26 }
  0x6f   : > { %1891 = vmatprep.subr.bf16.mxu0 %v2255_v18 }
  0x71   : > { %1880 = vmatmul.mubr.msk.bf16.vlgmr.msra.gmra.mxu0 %vm838_vm4, %v997_v28 }
  0x72   : > { %1892 = vmatpush3.bf16.msra.mxu0 %v2516_v20  ;;  %1895 = vmatprep.mubr.msk.bf16.mxu0 %vm2256_vm3, %v2255_v18 }
  0x73   : > { %1893 = vmatprep.subr.bf16.mxu0 %v2255_v18 }
  0x76   : > { %1894 = vmatpush3.bf16.msra.mxu0 %v2521_v21 }
  0x77   : > { %1907 = vmatprep.subr.bf16.mxu0 %v2255_v18 }
  0xd1   : > { %v892_v16 = vpop.permute.xlu1 %891 }
 0x11e   : > { %v1851_v29 = vpop.f32.mrf.mxu0 }
 0x11f   : > { %v689_v36 = vadd.f32 %v1851_v29, %v1733_v30 }
 0x120   : > { %v680_v31 = vpop.f32.mrf.mxu0 }
 0x121   : > { %v681_v39 = vadd.f32 %v1733_v30, %v680_v31 }
 0x122   : > { %v1852_v34 = vpop.f32.mrf.mxu0 }
 0x123   : > { %v692_v37 = vadd.f32 %v1852_v34, %v1733_v30 }
 0x124   : > { %v1857_v32 = vpop.f32.mrf.mxu1  ;;  %v683_v40 = vpop.f32.mrf.mxu0 }
 0x125   : > { %v785_v38 = vadd.f32 %v1857_v32, %v1742_v33  ;;  %v1803_v42 = vpack.c.bf16 %v692_v37, %v689_v36  ;;  %v684_v43 = vadd.f32 %v1733_v30, %v683_v40 }
 0x126   : > { %v776_v35 = vpop.f32.mrf.mxu1 }
 0x127   : > { %v777_v44 = vadd.f32 %v1742_v33, %v776_v35  ;;  %1815 = vst [vmem:[#allocation2 + $0x8] sm:$0xff] %v1803_v42   ;;  %v1798_v47 = vpack.c.bf16 %v684_v43, %v681_v39 }
 0x128   : > { %v1858_v41 = vpop.f32.mrf.mxu1 }
 0x129   : > { %v788_v45 = vadd.f32 %v1858_v41, %v1742_v33  ;;  %v876_v50 = vpop.f32.mrf.mxu0  ;;  %1799 = vst [vmem:[#allocation2] sm:$0xff] %v1798_v47  }
 0x12a   : > { %v779_v46 = vpop.f32.mrf.mxu1 }
 0x12b   : > { %v1813_v48 = vpack.c.bf16 %v788_v45, %v785_v38  ;;  %v780_v49 = vadd.f32 %v1742_v33, %v779_v46  ;;  %v1865_v52 = vpop.f32.mrf.mxu0 }
 0x12d   : > { %1816 = vst [vmem:[#allocation3 + $0x8] sm:$0xff] %v1813_v48   ;;  %v1808_v51 = vpack.c.bf16 %v780_v49, %v777_v44  ;;  %v879_v53 = vpop.f32.mrf.mxu0 }
 0x12f   : > { %1809 = vst [vmem:[#allocation3] sm:$0xff] %v1808_v51   ;;  %v1866_v54 = vpop.f32.mrf.mxu0 }
 0x130   : > { %v2568_v56 = vld [vmem:[#allocation2] sm:$0xff]  }
 0x131   : > { %v1047_v55 = vpop.f32.mrf.mxu0  ;;  %v824_v58 = vunpack.c.l.bf16 %v2568_v56  ;;  %v917_v39 = vunpack.c.h.bf16 %v2568_v56 }
 0x133   : > { %v1881_v60 = vpop.f32.mrf.mxu0  ;;  %v882_v61 = vadd.f32 %v876_v50, %v824_v58 }
 0x134   : > { %v2570_v57 = vld [vmem:[#allocation3 + $0x8] sm:$0xff]  }
 0x135   : > { %v996_v59 = vunpack.c.h.bf16 %v2570_v57  ;;  %v1050_v63 = vpop.f32.mrf.mxu0  ;;  %2042 = vtanh.f32 %v882_v61  ;;  %v1754_v4 = vmul.f32 -1.442695, %v882_v61  ;;  %v1084_v45 = vunpack.c.l.bf16 %v2570_v57 }
 0x137   : > { %v1053_v62 = vadd.f32 %v1047_v55, %v996_v59  ;;  %v1882_v0 = vpop.f32.mrf.mxu0 }
 0x139   : > { %2044 = vtanh.f32 %v1053_v62  ;;  %v1760_v5 = vmul.f32 -1.442695, %v1053_v62 }
 0x13a   : > { %2046 = vpow2.f32 %v1754_v4 }
 0x13b   : > { %2048 = vpow2.f32 %v1760_v5 }
 0x142   : > { %v2043_v1 = vpop.eup %2042 }
 0x143   : > { %896 = vrot.lane.b32.xlu0 %v2043_v1, %s2258_s10 }
 0x146   : > { %v2045_v2 = vpop.eup %2044 }
 0x147   : > { %1067 = vrot.lane.b32.xlu0 %v2045_v2, %s2258_s10  ;;  %v2047_v6 = vpop.eup %2046 }
 0x148   : > { %v886_v7 = vadd.f32 1.0, %v2047_v6  ;;  %v2049_v8 = vpop.eup %2048 }
 0x149   : > { %v1057_v9 = vadd.f32 1.0, %v2049_v8 }
 0x14a   : > { %2050 = vrcp.f32 %v886_v7 }
 0x14b   : > { %1062 = vrot.lane.b32.xlu0 %v822_v3, %s2257_s1  ;;  %2052 = vrcp.f32 %v1057_v9 }
 0x157   : > { %v2051_v10 = vpop.eup %2050 }
 0x158   : > { %v2053_v13 = vpop.eup %2052  ;;  %v894_v17 = vmul.f32 %v2051_v10, %v892_v16 }
 0x1b5   : > { %v897_v11 = vpop.permute.xlu0 %896 }
 0x1b6   : > { %v899_v12 = vmul.f32 %v2051_v10, %v897_v11 }
 0x1b8   : > { %901 = vrot.lane.b32.xlu1 %v899_v12, %s2257_s1 }
 0x1b9   : > { %v1068_v14 = vpop.permute.xlu0 %1067 }
 0x1ba   : > { %v1070_v15 = vmul.f32 %v2053_v13, %v1068_v14 }
 0x1bc   : > { %1072 = vrot.lane.b32.xlu1 %v1070_v15, %s2257_s1  ;;  %v2644_v15 = vld [vmem:[#allocation2 + $0x8] sm:$0xff]  }
 0x1bd   : > { %v1063_v19 = vpop.permute.xlu0 %1062  ;;  %v1172_v16 = vunpack.c.l.bf16 %v2644_v15 }
 0x1be   : > { %v1065_v24 = vmul.f32 %v2053_v13, %v1063_v19 }
 0x22a   : > { %v902_v22 = vpop.permute.xlu1 %901 }
 0x22b   : > { %v2579_v23 = vadd.f32 %v902_v22, %v894_v17 }
 0x22d   : > { %2054 = vtanh.f32 %v2579_v23 }
 0x22e   : > { %v1073_v27 = vpop.permute.xlu1 %1072 }
 0x22f   : > { %v2582_v28 = vadd.f32 %v1073_v27, %v1065_v24  ;;  %v2647_v24 = vld [vmem:[#allocation3] sm:$0xff]  }
 0x231   : > { %2056 = vtanh.f32 %v2582_v28 }
 0x23a   : > { %v2055_v29 = vpop.eup %2054 }
 0x23b   : > { %907 = vrot.lane.b32.xlu0 %v2055_v29, %s2258_s10 }
 0x23e   : > { %v2057_v30 = vpop.eup %2056 }
 0x23f   : > { %1078 = vrot.lane.b32.xlu1 %v2057_v30, %s2258_s10 }
 0x2ad   : > { %v908_v31 = vpop.permute.xlu0 %907 }
 0x2ae   : > { %v2587_v32 = vmul.f32 %v2051_v10, %v908_v31 }
 0x2b0   : > { %v918_v33 = vpack.c.bf16 %v2587_v32, %v2587_v32 }
 0x2b1   : > { %v1079_v34 = vpop.permute.xlu1 %1078 }
 0x2b2   : > { %v2591_v35 = vmul.f32 %v2053_v13, %v1079_v34  ;;  %920 = vrot.lane.b32.xlu0 %v918_v33, %s2257_s1 }
 0x2b4   : > { %v1085_v36 = vpack.c.bf16 %v2591_v35, %v2591_v35 }
 0x2b6   : > { %1087 = vrot.lane.b32.xlu1 %v1085_v36, %s2257_s1 }
 0x324   : > { %v921_v37 = vpop.permute.xlu0 %920 }
 0x325   : > { %1872 = vmatmul.mubr.msk.bf16.vlgmr.msra.gmra.mxu1 %vm838_vm4, %v921_v37 }
 0x326   : > { %1884 = vmatpush3.bf16.msra.mxu1 %v2538_v25  ;;  %1887 = vmatprep.mubr.msk.bf16.mxu1 %vm2256_vm3, %v2255_v18 }
 0x327   : > { %1885 = vmatprep.subr.bf16.mxu1 %v2255_v18 }
 0x328   : > { %v1088_v38 = vpop.permute.xlu1 %1087 }
 0x32a   : > { %1886 = vmatpush3.bf16.msra.mxu1 %v2548_v26 }
 0x32b   : > { %1899 = vmatprep.subr.bf16.mxu1 %v2255_v18 }
 0x32d   : > { %1888 = vmatmul.mubr.msk.bf16.vlgmr.msra.gmra.mxu1 %vm838_vm4, %v1088_v38 }
 0x32e   : > { %1900 = vmatpush3.bf16.msra.mxu1 %v2516_v20  ;;  %1903 = vmatprep.mubr.msk.bf16.mxu1 %vm2256_vm3, %v2255_v18 }
 0x32f   : > { %1901 = vmatprep.subr.bf16.mxu1 %v2255_v18 }
 0x332   : > { %1902 = vmatpush3.bf16.msra.mxu1 %v2521_v21 }
 0x333   : > { %1915 = vmatprep.subr.bf16.mxu1 %v2255_v18 }
 0x3e5   : > { %v959_v40 = vpop.f32.mrf.mxu1 }
 0x3e6   : > { %v965_v41 = vadd.f32 %v959_v40, %v917_v39 }
 0x3e7   : > { %v1873_v42 = vpop.f32.mrf.mxu1 }
 0x3e8   : > { %2058 = vtanh.f32 %v965_v41  ;;  %v1756_v51 = vmul.f32 -1.442695, %v965_v41 }
 0x3e9   : > { %v962_v43 = vpop.f32.mrf.mxu1 }
 0x3eb   : > { %v1874_v44 = vpop.f32.mrf.mxu1 }
 0x3ed   : > { %v1126_v20 = vpop.f32.mrf.mxu1 }
 0x3ee   : > { %v1132_v46 = vadd.f32 %v1126_v20, %v1084_v45 }
 0x3ef   : > { %v1889_v47 = vpop.f32.mrf.mxu1 }
 0x3f0   : > { %2060 = vtanh.f32 %v1132_v46  ;;  %v1762_v52 = vmul.f32 -1.442695, %v1132_v46 }
 0x3f1   : > { %v1129_v48 = vpop.f32.mrf.mxu1  ;;  %2062 = vpow2.f32 %v1756_v51 }
 0x3f2   : > { %2064 = vpow2.f32 %v1762_v52 }
 0x3f3   : > { %v1890_v49 = vpop.f32.mrf.mxu1 }
 0x3f5   : > { %v2059_v50 = vpop.eup %2058 }
 0x3f6   : > { %975 = vrot.lane.b32.xlu0 %v2059_v50, %s2258_s10 }
 0x3fd   : > { %v2061_v21 = vpop.eup %2060 }
 0x3fe   : > { %1142 = vrot.lane.b32.xlu1 %v2061_v21, %s2258_s10  ;;  %v2063_v53 = vpop.eup %2062 }
 0x3ff   : > { %v969_v54 = vadd.f32 1.0, %v2063_v53  ;;  %v2065_v55 = vpop.eup %2064 }
 0x400   : > { %v1136_v56 = vadd.f32 1.0, %v2065_v55 }
 0x401   : > { %2066 = vrcp.f32 %v969_v54 }
 0x402   : > { %2068 = vrcp.f32 %v1136_v56 }
 0x40e   : > { %v2067_v57 = vpop.eup %2066 }
 0x40f   : > { %v2069_v60 = vpop.eup %2068  ;;  %v973_v63 = vmul.f32 %v2067_v57, %v2579_v23 }
 0x410   : > { %v1140_v2 = vmul.f32 %v2069_v60, %v2582_v28  ;;  %v1324_v28 = vunpack.c.h.bf16 %v2647_v24 }
 0x468   : > { %v976_v58 = vpop.permute.xlu0 %975 }
 0x469   : > { %v978_v59 = vmul.f32 %v2067_v57, %v976_v58 }
 0x46b   : > { %980 = vrot.lane.b32.xlu0 %v978_v59, %s2257_s1 }
 0x470   : > { %v1143_v61 = vpop.permute.xlu1 %1142 }
 0x471   : > { %v1145_v62 = vmul.f32 %v2069_v60, %v1143_v61 }
 0x473   : > { %1147 = vrot.lane.b32.xlu1 %v1145_v62, %s2257_s1 }
 0x4dd   : > { %v981_v0 = vpop.permute.xlu0 %980 }
 0x4de   : > { %v2618_v1 = vadd.f32 %v981_v0, %v973_v63  ;;  %v1248_v0 = vunpack.c.h.bf16 %v2644_v15 }
 0x4e0   : > { %2070 = vtanh.f32 %v2618_v1 }
 0x4e5   : > { %v1148_v3 = vpop.permute.xlu1 %1147 }
 0x4e6   : > { %v2622_v4 = vadd.f32 %v1148_v3, %v1140_v2 }
 0x4e8   : > { %2072 = vtanh.f32 %v2622_v4 }
 0x4ed   : > { %v2071_v5 = vpop.eup %2070 }
 0x4ee   : > { %986 = vrot.lane.b32.xlu0 %v2071_v5, %s2258_s10 }
 0x4f5   : > { %v2073_v6 = vpop.eup %2072 }
 0x4f6   : > { %1153 = vrot.lane.b32.xlu1 %v2073_v6, %s2258_s10 }
 0x560   : > { %v987_v7 = vpop.permute.xlu0 %986 }
 0x561   : > { %v2627_v8 = vmul.f32 %v2067_v57, %v987_v7 }
 0x563   : > { %v1173_v9 = vpack.c.bf16 %v2627_v8, %v2627_v8 }
 0x565   : > { %1175 = vrot.lane.b32.xlu0 %v1173_v9, %s2257_s1 }
 0x568   : > { %v1154_v10 = vpop.permute.xlu1 %1153 }
 0x569   : > { %v2632_v11 = vmul.f32 %v2069_v60, %v1154_v10 }
 0x56b   : > { %v1325_v12 = vpack.c.bf16 %v2632_v11, %v2632_v11 }
 0x56d   : > { %1327 = vrot.lane.b32.xlu1 %v1325_v12, %s2257_s1 }
 0x5d7   : > { %v1176_v13 = vpop.permute.xlu0 %1175 }
 0x5d8   : > { %1896 = vmatmul.mubr.msk.bf16.vlgmr.msra.gmra.mxu0 %vm838_vm4, %v1176_v13 }
 0x5d9   : > { %1908 = vmatpush3.bf16.msra.mxu0 %v2538_v25  ;;  %1911 = vmatprep.mubr.msk.bf16.mxu0 %vm2256_vm3, %v2255_v18 }
 0x5da   : > { %1909 = vmatprep.subr.bf16.mxu0 %v2255_v18 }
 0x5dd   : > { %1910 = vmatpush3.bf16.msra.mxu0 %v2548_v26 }
 0x5df   : > { %v1328_v14 = vpop.permute.xlu1 %1327 }
 0x5e0   : > { %1912 = vmatmul.mubr.msk.bf16.vlgmr.msra.gmra.mxu0 %vm838_vm4, %v1328_v14 }
 0x698   : > { %v1214_v17 = vpop.f32.mrf.mxu0 }
 0x699   : > { %v1220_v19 = vadd.f32 %v1214_v17, %v1172_v16 }
 0x69a   : > { %v1897_v22 = vpop.f32.mrf.mxu0 }
 0x69b   : > { %2074 = vtanh.f32 %v1220_v19  ;;  %v1765_v38 = vmul.f32 -1.442695, %v1220_v19 }
 0x69c   : > { %v1217_v23 = vpop.f32.mrf.mxu0 }
 0x69e   : > { %v1898_v27 = vpop.f32.mrf.mxu0 }
 0x6a0   : > { %v1366_v29 = vpop.f32.mrf.mxu0 }
 0x6a1   : > { %v1372_v30 = vadd.f32 %v1366_v29, %v1324_v28 }
 0x6a2   : > { %v1913_v31 = vpop.f32.mrf.mxu0 }
 0x6a3   : > { %2076 = vtanh.f32 %v1372_v30  ;;  %v1769_v39 = vmul.f32 -1.442695, %v1372_v30 }
 0x6a4   : > { %v1369_v33 = vpop.f32.mrf.mxu0  ;;  %2078 = vpow2.f32 %v1765_v38 }
 0x6a5   : > { %2080 = vpow2.f32 %v1769_v39  ;;  %v1157_v39 = vmax.f32 %v2587_v32, %v2627_v8 }
 0x6a6   : > { %v1914_v34 = vpop.f32.mrf.mxu0 }
 0x6a8   : > { %v2075_v36 = vpop.eup %2074 }
 0x6a9   : > { %1230 = vrot.lane.b32.xlu0 %v2075_v36, %s2258_s10 }
 0x6b0   : > { %v2077_v37 = vpop.eup %2076 }
 0x6b1   : > { %1382 = vrot.lane.b32.xlu1 %v2077_v37, %s2258_s10  ;;  %v2079_v40 = vpop.eup %2078 }
 0x6b2   : > { %v1224_v41 = vadd.f32 1.0, %v2079_v40  ;;  %v2081_v42 = vpop.eup %2080 }
 0x6b3   : > { %v1376_v43 = vadd.f32 1.0, %v2081_v42 }
 0x6b4   : > { %2082 = vrcp.f32 %v1224_v41  ;;  %v1163_v41 = vmax.f32 %v2591_v35, %v2632_v11 }
 0x6b5   : > { %2084 = vrcp.f32 %v1376_v43 }
 0x6c1   : > { %v2083_v44 = vpop.eup %2082 }
 0x6c2   : > { %v2085_v46 = vpop.eup %2084  ;;  %v1228_v49 = vmul.f32 %v2083_v44, %v2618_v1 }
 0x6c3   : > { %v1380_v51 = vmul.f32 %v2085_v46, %v2622_v4 }
 0x71b   : > { %v1231_v45 = vpop.permute.xlu0 %1230 }
 0x71c   : > { %v1233_v20 = vmul.f32 %v2083_v44, %v1231_v45 }
 0x71e   : > { %1235 = vrot.lane.b32.xlu0 %v1233_v20, %s2257_s1 }
 0x723   : > { %v1383_v47 = vpop.permute.xlu1 %1382 }
 0x724   : > { %v1385_v48 = vmul.f32 %v2085_v46, %v1383_v47 }
 0x726   : > { %1387 = vrot.lane.b32.xlu1 %v1385_v48, %s2257_s1 }
 0x790   : > { %v1236_v50 = vpop.permute.xlu0 %1235 }
 0x791   : > { %v1238_v21 = vadd.f32 %v1236_v50, %v1228_v49 }
 0x793   : > { %2086 = vtanh.f32 %v1238_v21 }
 0x798   : > { %v1388_v52 = vpop.permute.xlu1 %1387 }
 0x799   : > { %v1390_v53 = vadd.f32 %v1388_v52, %v1380_v51 }
 0x79b   : > { %2088 = vtanh.f32 %v1390_v53 }
 0x7a0   : > { %v2087_v54 = vpop.eup %2086 }
 0x7a1   : > { %1241 = vrot.lane.b32.xlu0 %v2087_v54, %s2258_s10 }
 0x7a8   : > { %v2089_v55 = vpop.eup %2088 }
 0x7a9   : > { %1393 = vrot.lane.b32.xlu1 %v2089_v55, %s2258_s10 }
 0x813   : > { %v1242_v56 = vpop.permute.xlu0 %1241 }
 0x814   : > { %v2658_v57 = vmul.f32 %v2083_v44, %v1242_v56 }
 0x816   : > { %v1249_v58 = vpack.c.bf16 %v2658_v57, %v2658_v57 }
 0x818   : > { %1251 = vrot.lane.b32.xlu0 %v1249_v58, %s2257_s1 }
 0x81b   : > { %v1394_v59 = vpop.permute.xlu1 %1393 }
 0x81c   : > { %v2663_v60 = vmul.f32 %v2085_v46, %v1394_v59 }
 0x81e   : > { %v1399_v61 = vpack.c.bf16 %v2663_v60, %v2663_v60 }
 0x820   : > { %1401 = vrot.lane.b32.xlu1 %v1399_v61, %s2257_s1 }
 0x88a   : > { %v1252_v62 = vpop.permute.xlu0 %1251 }
 0x88b   : > { %1904 = vmatmul.mubr.msk.bf16.vlgmr.msra.gmra.mxu1 %vm838_vm4, %v1252_v62 }
 0x88c   : > { %1916 = vmatpush3.bf16.msra.mxu1 %v2538_v25  ;;  %1919 = vmatprep.mubr.msk.bf16.mxu1 %vm2256_vm3, %v2255_v18  ;;  %v1398_v25 = vunpack.c.l.bf16 %v2647_v24 }
 0x88d   : > { %1917 = vmatprep.subr.bf16.mxu1 %v2255_v18 }
 0x890   : > { %1918 = vmatpush3.bf16.msra.mxu1 %v2548_v26 }
 0x892   : > { %v1402_v63 = vpop.permute.xlu1 %1401 }
 0x893   : > { %1920 = vmatmul.mubr.msk.bf16.vlgmr.msra.gmra.mxu1 %vm838_vm4, %v1402_v63 }
 0x94b   : > { %v1290_v1 = vpop.f32.mrf.mxu1 }
 0x94c   : > { %v1296_v2 = vadd.f32 %v1290_v1, %v1248_v0 }
 0x94d   : > { %v1905_v3 = vpop.f32.mrf.mxu1 }
 0x94e   : > { %2090 = vtanh.f32 %v1296_v2  ;;  %v1767_v13 = vmul.f32 -1.442695, %v1296_v2 }
 0x94f   : > { %v1293_v4 = vpop.f32.mrf.mxu1 }
 0x951   : > { %v1906_v5 = vpop.f32.mrf.mxu1 }
 0x953   : > { %v1440_v6 = vpop.f32.mrf.mxu1 }
 0x954   : > { %v1446_v7 = vadd.f32 %v1440_v6, %v1398_v25 }
 0x955   : > { %v1921_v9 = vpop.f32.mrf.mxu1 }
 0x956   : > { %2092 = vtanh.f32 %v1446_v7  ;;  %v1771_v14 = vmul.f32 -1.442695, %v1446_v7 }
 0x957   : > { %v1443_v18 = vpop.f32.mrf.mxu1  ;;  %2094 = vpow2.f32 %v1767_v13 }
 0x958   : > { %2096 = vpow2.f32 %v1771_v14 }
 0x959   : > { %v1922_v10 = vpop.f32.mrf.mxu1 }
 0x95b   : > { %v2091_v26 = vpop.eup %2090 }
 0x95c   : > { %1306 = vrot.lane.b32.xlu0 %v2091_v26, %s2258_s10 }
 0x963   : > { %v2093_v12 = vpop.eup %2092 }
 0x964   : > { %1456 = vrot.lane.b32.xlu1 %v2093_v12, %s2258_s10  ;;  %v2095_v15 = vpop.eup %2094 }
 0x965   : > { %v1300_v16 = vadd.f32 1.0, %v2095_v15  ;;  %v2097_v17 = vpop.eup %2096 }
 0x966   : > { %v1450_v19 = vadd.f32 1.0, %v2097_v17 }
 0x967   : > { %2098 = vrcp.f32 %v1300_v16 }
 0x968   : > { %2100 = vrcp.f32 %v1450_v19 }
 0x974   : > { %v2099_v22 = vpop.eup %2098 }
 0x975   : > { %v2101_v27 = vpop.eup %2100  ;;  %v1304_v30 = vmul.f32 %v2099_v22, %v1238_v21 }
 0x976   : > { %v1454_v34 = vmul.f32 %v2101_v27, %v1390_v53 }
 0x9ce   : > { %v1307_v23 = vpop.permute.xlu0 %1306 }
 0x9cf   : > { %v1309_v24 = vmul.f32 %v2099_v22, %v1307_v23 }
 0x9d1   : > { %1311 = vrot.lane.b32.xlu0 %v1309_v24, %s2257_s1 }
 0x9d6   : > { %v1457_v28 = vpop.permute.xlu1 %1456 }
 0x9d7   : > { %v1459_v29 = vmul.f32 %v2101_v27, %v1457_v28 }
 0x9d9   : > { %1461 = vrot.lane.b32.xlu1 %v1459_v29, %s2257_s1 }
 0xa43   : > { %v1312_v31 = vpop.permute.xlu0 %1311 }
 0xa44   : > { %v1314_v33 = vadd.f32 %v1312_v31, %v1304_v30 }
 0xa46   : > { %2102 = vtanh.f32 %v1314_v33 }
 0xa4b   : > { %v1462_v36 = vpop.permute.xlu1 %1461 }
 0xa4c   : > { %v1464_v37 = vadd.f32 %v1462_v36, %v1454_v34 }
 0xa4e   : > { %2104 = vtanh.f32 %v1464_v37 }
 0xa53   : > { %v2103_v38 = vpop.eup %2102 }
 0xa54   : > { %1317 = vrot.lane.b32.xlu0 %v2103_v38, %s2258_s10 }
 0xa58   : > { %1159 = vrot.lane.b32.xlu0 %v1157_v39, %s2257_s1 }
 0xa5b   : > { %v2105_v40 = vpop.eup %2104 }
 0xa5c   : > { %1467 = vrot.lane.b32.xlu1 %v2105_v40, %s2258_s10 }
 0xa60   : > { %1165 = vrot.lane.b32.xlu1 %v1163_v41, %s2257_s1 }
 0xa64   : > { %1490 = vrot.lane.b32.xlu1 %v1314_v33, %s2259_s15 }
 0xac6   : > { %v1318_v42 = vpop.permute.xlu0 %1317 }
 0xac7   : > { %v1320_v43 = vmul.f32 %v2099_v22, %v1318_v42 }
 0xac9   : > { %1485 = vrot.lane.b32.xlu0 %v1320_v43, %s2257_s1  ;;  %v1471_v8 = vmax.f32 %v2658_v57, %v1320_v43 }
 0xaca   : > { %v1160_v32 = vpop.permute.xlu0 %1159 }
 0xacb   : > { %1162 = vst.msk [vmem:[%s2497_s26] sm:$0xff] %vm838_vm4, %v1160_v32 }
 0xacd   : > { %1473 = vrot.lane.b32.xlu0 %v1471_v8, %s2257_s1 }
 0xace   : > { %v1468_v35 = vpop.permute.xlu1 %1467 }
 0xacf   : > { %v1470_v11 = vmul.f32 %v2101_v27, %v1468_v35 }
 0xad1   : > { %v1478_v44 = vmax.f32 %v2663_v60, %v1470_v11  ;;  %1495 = vrot.lane.b32.xlu0 %v1470_v11, %s2257_s1 }
 0xad2   : > { %v1166_v45 = vpop.permute.xlu1 %1165 }
 0xad3   : > { %1763 = vst.msk [vmem:[%s2500_s25 + $0x8] sm:$0xff] %vm838_vm4, %v1166_v45  ;;  %1480 = vrot.lane.b32.xlu1 %v1478_v44, %s2257_s1 }
 0xad6   : > { %v1491_v20 = vpop.permute.xlu1 %1490 }
 0xad7   : > { %1493 = vst.msk [vmem:[#allocation5] sm:$0xff] %vm838_vm4, %v1491_v20  ;;  %1500 = vrot.lane.b32.xlu1 %v1464_v37, %s2259_s15  ;;  %s1544_s15 = sshll.u32 %s2500_s25, 4  ;;  %s2755_s15 = int_to_ptr.vmem [resolvable:$true] %s1544_s15 }
 0xb3b   : > { %v1486_v46 = vpop.permute.xlu0 %1485 }
 0xb3c   : > { %1488 = vst.msk [vmem:[#allocation4] sm:$0xff] %vm838_vm4, %v1486_v46 }
 0xb3f   : > { %v1474_v47 = vpop.permute.xlu0 %1473 }
 0xb40   : > { %1772 = vst.msk [vmem:[%s2497_s26 + $0x8] sm:$0xff] %vm838_vm4, %v1474_v47 }
 0xb41   : > { %2119 = shalt.err (!%p2116_p5)
}
 0xb42   : > { %s2120_s26 = scalar_lea.hbm %s2709_s2, 256  ;;  %s2124_s1 = scalar_lea.hbm %s2880_s29, 1536 }
 0xb43   : > { %p2121_p6 = scmp.ne.s32.totalorder %s2709_s2, %s2120_s26  ;;  %p2125_p9 = scmp.lt.s32.totalorder %s2709_s2, %s2880_s29 }
 0xb44   : > { %p2126_p11 = scmp.lt.s32.totalorder %s2124_s1, %s2120_s26 }
 0xb45   : > { %p2122_p7 = pnand %p2121_p6, %p2425_p10 }
 0xb46   : > { %p2127_p12 = por %p2126_p11, %p2125_p9 }
 0xb47   : > { %p2123_p8 = pneg %p2122_p7 }
 0xb49   : > { %p2128_p0 = pnand %p2127_p12, %p2123_p8 }
 0xb4b   : > { %2131 = shalt.err (!%p2128_p0)
}
 0xb4c   : > { %s2261_s16 = smov 128   ;;  %s2262_s14 = smov 256   ;;  %v1496_v48 = vpop.permute.xlu0 %1495  ;;  %v1481_v49 = vpop.permute.xlu1 %1480 }
 0xb4d   : > { %s2263_s30 = smov 8   ;;  %1498 = vst.msk [vmem:[#allocation6] sm:$0xff] %vm838_vm4, %v1496_v48  ;;  %s2882_s10 = sld [smem:[#allocation31_spill]]  ;;  %1483 = vst.msk [vmem:[%s2500_s25] sm:$0xff] %vm838_vm4, %v1481_v49 }
 0xb4e   : > { %1925 = dma.vmem_to_hbm [thread:$0]  (%p2425_p10), %s2711_s13, 256, %s2709_s2, %s2720_s24, %s2261_s16, %s2262_s14, %s2263_s30  }
 0xb4f   : > { %s2883_s6 = sand.u32 1, %s2220_s19   ;;  %s2132_s2 = scalar_lea.vmem %s2755_s15, 256 }
 0xb50   : > { %s1510_s0 = scalar_lea.sflag [#allocation13], %s2883_s6  ;;  %p2133_p10 = scmp.ne.s32.totalorder %s2755_s15, %s2132_s2 }
 0xb51   : > { %s2264_s13 = smov [#allocation12]  }
 0xb52   : > { %p2134_p4 = pnand %p2133_p10, %p2442_p13  ;;  %s2136_s24 = sshll.u32 %s2264_s13, 4  ;;  %s2137_s24 = int_to_ptr.vmem [resolvable:$false] %s2136_s24 }
 0xb53   : > { %s2751_s1 = scalar_lea.hbm %s2882_s10, %s2715_s23  ;;  %s2138_s23 = scalar_lea.vmem %s2137_s24, 512 }
 0xb54   : > { %p2135_p3 = pneg %p2134_p4  ;;  %p2139_p5 = scmp.lt.s32.totalorder %s2755_s15, %s2137_s24 }
 0xb55   : > { %p2140_p6 = scmp.lt.s32.totalorder %s2138_s23, %s2132_s2 }
 0xb57   : > { %p2141_p7 = por %p2140_p6, %p2139_p5 }
 0xb59   : > { %p2142_p8 = pnand %p2141_p7, %p2135_p3 }
 0xb5b   : > { %2145 = shalt.err (!%p2142_p8)
}
 0xb5c   : > { %s2146_s25 = scalar_lea.hbm %s2751_s1, 256  ;;  %s2150_s5 = scalar_lea.hbm %s2882_s10, 1536 }
 0xb5d   : > { %p2147_p9 = scmp.ne.s32.totalorder %s2751_s1, %s2146_s25  ;;  %p2151_p0 = scmp.lt.s32.totalorder %s2751_s1, %s2882_s10 }
 0xb5e   : > { %p2152_p10 = scmp.lt.s32.totalorder %s2150_s5, %s2146_s25 }
 0xb5f   : > { %p2148_p11 = pnand %p2147_p9, %p2442_p13 }
 0xb60   : > { %p2153_p4 = por %p2152_p10, %p2151_p0 }
 0xb61   : > { %p2149_p12 = pneg %p2148_p11 }
 0xb63   : > { %p2154_p3 = pnand %p2153_p4, %p2149_p12 }
 0xb65   : > { %2157 = shalt.err (!%p2154_p3)
}
 0xb66   : > { %1926 = dma.vmem_to_hbm [thread:$0]  (%p2442_p13), %s2755_s15, 256, %s2751_s1, %s1510_s0, %s2261_s16, %s2262_s14, %s2263_s30   ;;  %v1501_v50 = vpop.permute.xlu1 %1500 }
 0xb67   : > { %1503 = vst.msk [vmem:[#allocation7] sm:$0xff] %vm838_vm4, %v1501_v50 }
 0xb68 PF: > { %p1936_p5 = scmp.ge.s32.totalorder %s2252_s27, 2  ;;  %s1559_s2 = sand.u32 1, %s2216_s18  }
 0xb69   : > { %s1560_s24 = scalar_lea.sflag [#allocation11], %s1559_s2 }
 0xb6a   : > { %p1930_p6 = pnand %p1936_p5, %p2448_p2 }
 0xb6c   : > { %p1931_p7 = pneg %p1930_p6 }
 0xb6e   : > { %2203 = dma.done.wait (%p1931_p7), %s1560_s24, 256  }
 0xb6f   : > { %2205 = vsyncadd (%p1931_p7), %s1560_s24, 4294967040  ;;  %s1568_s7 = sand.u32 1, %s2212_s17   ;;  %p1933_p13 = pnand %p1936_p5, %p2452_p1 }
 0xb70   : > { %s1569_s15 = scalar_lea.sflag [#allocation13], %s1568_s7 }
 0xb71   : > { %p1934_p8 = pneg %p1933_p13 }
 0xb73   : > { %2207 = dma.done.wait (%p1934_p8), %s1569_s15, 256  }
 0xb74   : > { %2209 = vsyncadd (%p1934_p8), %s1569_s15, 4294967040  ;;  %s28_s27 = sadd.s32 1, %s2252_s27   ;;  %s2884_s8 = sld [smem:[#allocation21_spill]] }
 0xb75   : > { %p25_p9 = scmp.ge.s32.totalorder %s28_s27, 8   ;;  %s2885_s16 = sld [smem:[#allocation20_spill]] }
 0xb76   : > { %s2886_s23 = sld [smem:[#allocation16_spill]]  ;;  %s2890_s17 = smov %s2220_s19 }
 0xb77   : > { %s2887_s24 = sld [smem:[#allocation17_spill]]  ;;  %s2891_s18 = smov %s2228_s21 }
 0xb78   : > { %s2888_s25 = sld [smem:[#allocation18_spill]]  ;;  %s2892_s19 = smov %s2224_s20 }
 0xb79   : > { %s2889_s26 = sld [smem:[#allocation19_spill]]  ;;  %s2894_s21 = smov %s2232_s22 }
 0xb7a   : > { %s2893_s20 = smov %s2884_s8  ;;  %27 = sbr.rel (!%p25_p9) target bundleno = 20 (0x14), region = 225 }
 0xb7b   : > { %s2895_s22 = smov %s2885_s16 }
 0xb7f   :  { %1574 = vsyncpa [#allocation11], 1 }
 0xb80   :  { %1576 = vsyncpa [#allocation11 + $0x1], 1 }
 0xb81   :  { %1577 = vsyncpa [#allocation13], 1 }
 0xb82   :  { %1579 = vsyncpa [#allocation13 + $0x1], 1 }

</bundles_post_ra>
